<compile_context>
chip_gen: v6e
topology: v6e:2x2x1
jax: 0.10.0
libtpu: 0.0.40
codegen_flags: <defaults>
</compile_context>

<pallas_src>
import math
import numpy as np
import jax
import jax.numpy as jnp
from jax.experimental import pallas as pl
from jax.experimental.pallas import tpu as pltpu

# ----------------------------- configuration --------------------------------
BATCH      = 2
NUM_DOCS   = 4
NUM_CHUNKS = 2
SEQ        = 8
HIDDEN     = 32
FFN        = 64
VOCAB      = 64
LORA_RANK  = 8
LORA_ALPHA = 32
NUM_LABELS = 1
LORA_SCALE = float(LORA_ALPHA) / float(LORA_RANK)
N_SEQ      = BATCH * NUM_DOCS * NUM_CHUNKS          # 16 sequences
N_TOK      = N_SEQ * SEQ                            # 128 token rows
INV_SQRT_H = 1.0 / math.sqrt(HIDDEN)
INV_C      = 1.0 / NUM_CHUNKS

# --- packed weight slab layout (lane width 64 == 2*HIDDEN == FFN) ---
W_COLS = 2 * HIDDEN
R_WQ, R_WKV, R_WO, R_W1, R_W2 = 0, 32, 64, 128, 160
W_ROWS = 224
# --- packed small-param slab layout (lane width 128) ---
P_ROWS = 48


# ------------------------------ fused kernel --------------------------------
def _layernorm(x, gamma, beta, eps=1e-5):
    mu = jnp.mean(x, axis=-1, keepdims=True)
    xc = x - mu
    var = jnp.mean(xc * xc, axis=-1, keepdims=True)
    return xc * jax.lax.rsqrt(var + eps) * gamma + beta


def fused_forward_kernel(x2_ref, xcls_ref, attb_ref, w_ref, p_ref,
                         docb_ref, docw_ref, out_ref):
    f32 = jnp.float32
    H, H2 = HIDDEN, 2 * HIDDEN

    x2 = x2_ref[...]            # (128, 32)  all tokens (K/V path)
    x_cls = xcls_ref[...]       # (16, 32)   CLS rows   (Q path + residual)

    # ---- static views into the packed weight slab ----
    wq_ext = w_ref[R_WQ:R_WQ + H, :]                 # (32, 64)  [Wq | 0]
    wkv    = w_ref[R_WKV:R_WKV + H, :]               # (32, 64)  [Wk | Wv]
    wo_ext = w_ref[R_WO:R_WO + H2, 0:H]              # (64, 32)  [0 ; Wo]
    w1     = w_ref[R_W1:R_W1 + H, 0:FFN]             # (32, 64)
    w2     = w_ref[R_W2:R_W2 + FFN, 0:H]             # (64, 32)

    # ---- static views into the packed small-param slab ----
    bq_ext = p_ref[0:1, 0:H2]
    bkv    = p_ref[1:2, 0:H2]
    bo     = p_ref[2:3, 0:H]
    ln1g   = p_ref[3:4, 0:H]
    ln1b   = p_ref[4:5, 0:H]
    b1     = p_ref[5:6, 0:FFN]
    b2     = p_ref[6:7, 0:H]
    ln2g   = p_ref[7:8, 0:H]
    ln2b   = p_ref[8:9, 0:H]
    w_att  = p_ref[9:10, 0:H]
    w_cls  = p_ref[10:11, 0:H]
    b_att  = p_ref[11:12, 0:1]
    b_cls  = p_ref[12:13, 0:1]
    d_ind  = p_ref[16:16 + N_SEQ, 0:NUM_DOCS]        # (16, 4)  chunk -> doc one-hot
    b_ind  = p_ref[32:32 + BATCH, 0:N_SEQ]           # (2, 16)  chunk -> batch one-hot
    d_indt = p_ref[40:40 + NUM_DOCS, 0:N_SEQ]        # (4, 16)

    # ---- projections: Q only from CLS rows, K|V fused over all tokens ----
    q = jnp.dot(x_cls, wq_ext, preferred_element_type=f32) + bq_ext     # (16, 64), V-lanes = 0
    kv = jnp.dot(x2, wkv, preferred_element_type=f32) + bkv             # (128, 64) = [K | V]
    kv3 = kv.reshape(N_SEQ, SEQ, H2)                                    # layout-preserving

    # ---- CLS-query attention (scores see only K; Q's V-lanes are zero) ----
    scores = jnp.sum(q[:, None, :] * kv3, axis=-1) * INV_SQRT_H         # (16, 8)
    scores = scores + attb_ref[...]                                     # additive key mask
    scores = scores - jnp.max(scores, axis=-1, keepdims=True)
    e = jnp.exp(scores)
    probs = e * pl.reciprocal(jnp.sum(e, axis=-1, keepdims=True), approx=True)
    ctx = jnp.sum(probs[:, :, None] * kv3, axis=1)                      # (16, 64) = [junk | ctx]

    # ---- post-attention / FFN on the 16 CLS rows only ----
    attn = jnp.dot(ctx, wo_ext, preferred_element_type=f32) + bo        # zero rows kill K junk
    h = _layernorm(x_cls + attn, ln1g, ln1b)
    ff = jnp.dot(h, w1, preferred_element_type=f32) + b1
    ff = jax.nn.gelu(ff, approximate=True)
    ff = jnp.dot(ff, w2, preferred_element_type=f32) + b2
    cls = _layernorm(h + ff, ln2g, ln2b)                                # (16, 32)

    # ---- classification head (chunk-mean, doc attention, time weights) ----
    s_att = jnp.sum(cls * w_att, axis=-1, keepdims=True)                # (16, 1)
    z = s_att * d_ind                                                   # (16, 4)
    att = jnp.dot(b_ind, z, preferred_element_type=f32) * INV_C + b_att # (2, 4) doc logits
    att = att + docb_ref[...]                                           # masked_fill(-inf)
    att = att - jnp.max(att, axis=-1, keepdims=True)
    e2 = jnp.exp(att)
    w = e2 * pl.reciprocal(jnp.sum(e2, axis=-1, keepdims=True), approx=True)
    w = w * docw_ref[...]                                               # * time_weights * mask
    w = w * pl.reciprocal(jnp.maximum(jnp.sum(w, axis=-1, keepdims=True), 1e-9), approx=True)

    w_chunk = jnp.dot(w, d_indt, preferred_element_type=f32) * b_ind * INV_C   # (2, 16)
    patient = jnp.dot(w_chunk, cls, preferred_element_type=f32)                # (2, 32)
    logits = jnp.sum(patient * w_cls, axis=-1, keepdims=True) + b_cls          # (2, 1)
    out_ref[...] = 1.0 / (1.0 + jnp.exp(-logits))                              # sigmoid


# ---------------------- one-time parameter packing ---------------------------
def prepare_packed_params(params):
    """Merge LoRA into Q/K/V and pack all weights / small params into two slabs.

    Runs once at parameter-load time (outside the per-call jit)."""
    wq = params["wqkv"][0] + LORA_SCALE * params["la"][0] @ params["lb"][0]
    wk = params["wqkv"][1] + LORA_SCALE * params["la"][1] @ params["lb"][1]
    wv = params["wqkv"][2] + LORA_SCALE * params["la"][2] @ params["lb"][2]

    w_slab = jnp.zeros((W_ROWS, W_COLS), jnp.float32)
    w_slab = w_slab.at[R_WQ:R_WQ + HIDDEN, 0:HIDDEN].set(wq)
    w_slab = w_slab.at[R_WKV:R_WKV + HIDDEN, 0:HIDDEN].set(wk)
    w_slab = w_slab.at[R_WKV:R_WKV + HIDDEN, HIDDEN:2 * HIDDEN].set(wv)
    w_slab = w_slab.at[R_WO + HIDDEN:R_WO + 2 * HIDDEN, 0:HIDDEN].set(params["wo"])
    w_slab = w_slab.at[R_W1:R_W1 + HIDDEN, 0:FFN].set(params["w1"])
    w_slab = w_slab.at[R_W2:R_W2 + FFN, 0:HIDDEN].set(params["w2"])

    p = np.zeros((P_ROWS, 128), np.float32)
    p[0, 0:HIDDEN] = np.asarray(params["bqkv"][0, 0])
    p[1, 0:HIDDEN] = np.asarray(params["bqkv"][1, 0])
    p[1, HIDDEN:2 * HIDDEN] = np.asarray(params["bqkv"][2, 0])
    p[2, 0:HIDDEN] = np.asarray(params["bo"][0])
    p[3, 0:HIDDEN] = np.asarray(params["ln1"][0, 0])
    p[4, 0:HIDDEN] = np.asarray(params["ln1"][1, 0])
    p[5, 0:FFN] = np.asarray(params["b1"][0])
    p[6, 0:HIDDEN] = np.asarray(params["b2"][0])
    p[7, 0:HIDDEN] = np.asarray(params["ln2"][0, 0])
    p[8, 0:HIDDEN] = np.asarray(params["ln2"][1, 0])
    p[9, 0:HIDDEN] = np.asarray(params["w_att"][:, 0])
    p[10, 0:HIDDEN] = np.asarray(params["w_cls"][:, 0])
    p[11, 0] = float(params["b_att"][0, 0])
    p[12, 0] = float(params["b_cls"][0, 0])

    # constant chunk<->doc / chunk<->batch pooling matrices (compile-time numpy)
    seqs = np.arange(N_SEQ)
    d_of = (seqs % (NUM_DOCS * NUM_CHUNKS)) // NUM_CHUNKS
    b_of = seqs // (NUM_DOCS * NUM_CHUNKS)
    d_ind = (d_of[:, None] == np.arange(NUM_DOCS)[None, :]).astype(np.float32)
    b_ind = (b_of[None, :] == np.arange(BATCH)[:, None]).astype(np.float32)
    p[16:16 + N_SEQ, 0:NUM_DOCS] = d_ind
    p[32:32 + BATCH, 0:N_SEQ] = b_ind
    p[40:40 + NUM_DOCS, 0:N_SEQ] = d_ind.T

    return w_slab, jnp.asarray(p)


# -------------------------------- forward ------------------------------------
def forward(input_ids, attention_mask, time_info, tok_emb, pos_emb, w_slab, p_slab):
    ids = input_ids.reshape(N_SEQ, SEQ)
    # embedding lookup stays in plain JAX (gather; glue only)
    x = (tok_emb[ids] + pos_emb[None, :, :]).astype(jnp.float32)        # (16, 8, 32)
    x_cls = x[:, 0, :]                                                  # (16, 32) CLS rows
    x2 = x.reshape(N_TOK, HIDDEN)                                       # (128, 32)

    # additive key-position mask bias (0 valid, -1e9 padded)
    mask = attention_mask.reshape(N_SEQ, SEQ).astype(jnp.float32)
    att_bias = (mask - 1.0) * 1e9

    # doc mask bias / combined time weights (precomputed wrapper glue)
    doc_mask = (time_info != -1.0).astype(jnp.float32)                  # (2, 4)
    doc_bias = (doc_mask - 1.0) * 1e30
    doc_wgt = jnp.exp(-0.1 * jnp.maximum(time_info, 0.0)) * doc_mask

    vmem = pltpu.MemorySpace.VMEM
    probs = pl.pallas_call(
        fused_forward_kernel,
        out_shape=jax.ShapeDtypeStruct((BATCH, NUM_LABELS), jnp.float32),
        in_specs=[pl.BlockSpec(memory_space=vmem)] * 7,
        out_specs=pl.BlockSpec(memory_space=vmem),
    )(x2, x_cls, att_bias, w_slab, p_slab, doc_bias, doc_wgt)
    return probs[:, 0]                                                  # .squeeze()


# ------------------------------ parameter init -------------------------------
def init_params(key):
    ks = jax.random.split(key, 16)

    def nrm(k, shape, scale=0.02):
        return (scale * jax.random.normal(k, shape)).astype(jnp.float32)

    ln = jnp.stack([jnp.ones((1, HIDDEN), jnp.float32),
                    jnp.zeros((1, HIDDEN), jnp.float32)], axis=0)
    return {
        "tok_emb": nrm(ks[0], (VOCAB, HIDDEN)),
        "pos_emb": nrm(ks[1], (SEQ, HIDDEN)),
        "wqkv":    nrm(ks[2], (3, HIDDEN, HIDDEN)),
        "la":      nrm(ks[3], (3, HIDDEN, LORA_RANK)),
        "lb":      nrm(ks[4], (3, LORA_RANK, HIDDEN)),  # non-zero so LoRA path is exercised
        "bqkv":    nrm(ks[5], (3, 1, HIDDEN)),
        "wo":      nrm(ks[6], (HIDDEN, HIDDEN)),
        "bo":      nrm(ks[7], (1, HIDDEN)),
        "ln1":     ln,
        "w1":      nrm(ks[8], (HIDDEN, FFN)),
        "b1":      nrm(ks[9], (1, FFN)),
        "w2":      nrm(ks[10], (FFN, HIDDEN)),
        "b2":      nrm(ks[11], (1, HIDDEN)),
        "ln2":     ln,
        "w_att":   nrm(ks[12], (HIDDEN, 1)),
        "b_att":   nrm(ks[13], (1, 1)),
        "w_cls":   nrm(ks[14], (HIDDEN, NUM_LABELS)),
        "b_cls":   nrm(ks[15], (1, NUM_LABELS)),
    }


# ----------------------------------- main ------------------------------------
if __name__ == "__main__":
    key = jax.random.PRNGKey(0)
    k_ids, k_len, k_time, k_params = jax.random.split(key, 4)

    params = init_params(k_params)
    w_slab, p_slab = prepare_packed_params(params)   # one-time LoRA merge + packing

    input_ids = jax.random.randint(
        k_ids, (BATCH, NUM_DOCS, NUM_CHUNKS, SEQ), 0, VOCAB, dtype=jnp.int32)

    lengths = jax.random.randint(
        k_len, (BATCH, NUM_DOCS, NUM_CHUNKS), 4, SEQ + 1, dtype=jnp.int32)
    attention_mask = (jnp.arange(SEQ)[None, None, None, :]
                      < lengths[..., None]).astype(jnp.float32)

    time_info = jax.random.uniform(
        k_time, (BATCH, NUM_DOCS), minval=0.0, maxval=30.0, dtype=jnp.float32)
    time_info = time_info.at[0, 3].set(-1.0)   # one padded document

    fwd = jax.jit(forward)
    out = fwd(input_ids, attention_mask, time_info,
              params["tok_emb"], params["pos_emb"], w_slab, p_slab)
    out = jax.block_until_ready(out)
    assert out.shape == (BATCH,)
    assert bool(jnp.all(jnp.isfinite(out)))
    print("KERNEL_OK")
</pallas_src>

<mosaic_0001>
module attributes {stable_mosaic.version = 11 : i64} {
  func.func @fused_forward_kernel(%arg0: memref<128x32xf32, #tpu.memory_space<vmem>>, %arg1: memref<16x32xf32, #tpu.memory_space<vmem>>, %arg2: memref<16x8xf32, #tpu.memory_space<vmem>>, %arg3: memref<224x64xf32, #tpu.memory_space<vmem>>, %arg4: memref<48x128xf32, #tpu.memory_space<vmem>>, %arg5: memref<2x4xf32, #tpu.memory_space<vmem>>, %arg6: memref<2x4xf32, #tpu.memory_space<vmem>>, %arg7: memref<2x1xf32, #tpu.memory_space<vmem>>) attributes {dimension_semantics = [], scalar_prefetch = 0 : i64, scratch_operands = 0 : i64, tpu.core_type = #tpu.core_type<tc>} {
    %c0 = arith.constant 0 : index
    %c0_0 = arith.constant 0 : index
    %0 = vector.load %arg0[%c0, %c0_0] : memref<128x32xf32, #tpu.memory_space<vmem>>, vector<128x32xf32>
    %c0_1 = arith.constant 0 : index
    %c0_2 = arith.constant 0 : index
    %1 = vector.load %arg1[%c0_1, %c0_2] : memref<16x32xf32, #tpu.memory_space<vmem>>, vector<16x32xf32>
    %c0_3 = arith.constant 0 : index
    %c0_4 = arith.constant 0 : index
    %2 = vector.load %arg3[%c0_3, %c0_4] : memref<224x64xf32, #tpu.memory_space<vmem>>, vector<32x64xf32>
    %c32 = arith.constant 32 : index
    %c0_5 = arith.constant 0 : index
    %3 = vector.load %arg3[%c32, %c0_5] : memref<224x64xf32, #tpu.memory_space<vmem>>, vector<32x64xf32>
    %c64 = arith.constant 64 : index
    %c0_6 = arith.constant 0 : index
    %4 = vector.load %arg3[%c64, %c0_6] : memref<224x64xf32, #tpu.memory_space<vmem>>, vector<64x32xf32>
    %c128 = arith.constant 128 : index
    %c0_7 = arith.constant 0 : index
    %5 = vector.load %arg3[%c128, %c0_7] : memref<224x64xf32, #tpu.memory_space<vmem>>, vector<32x64xf32>
    %c160 = arith.constant 160 : index
    %c0_8 = arith.constant 0 : index
    %6 = vector.load %arg3[%c160, %c0_8] : memref<224x64xf32, #tpu.memory_space<vmem>>, vector<64x32xf32>
    %c0_9 = arith.constant 0 : index
    %c0_10 = arith.constant 0 : index
    %7 = vector.load %arg4[%c0_9, %c0_10] : memref<48x128xf32, #tpu.memory_space<vmem>>, vector<1x64xf32>
    %c1 = arith.constant 1 : index
    %c0_11 = arith.constant 0 : index
    %8 = vector.load %arg4[%c1, %c0_11] : memref<48x128xf32, #tpu.memory_space<vmem>>, vector<1x64xf32>
    %c2 = arith.constant 2 : index
    %c0_12 = arith.constant 0 : index
    %9 = vector.load %arg4[%c2, %c0_12] : memref<48x128xf32, #tpu.memory_space<vmem>>, vector<1x32xf32>
    %c3 = arith.constant 3 : index
    %c0_13 = arith.constant 0 : index
    %10 = vector.load %arg4[%c3, %c0_13] : memref<48x128xf32, #tpu.memory_space<vmem>>, vector<1x32xf32>
    %c4 = arith.constant 4 : index
    %c0_14 = arith.constant 0 : index
    %11 = vector.load %arg4[%c4, %c0_14] : memref<48x128xf32, #tpu.memory_space<vmem>>, vector<1x32xf32>
    %c5 = arith.constant 5 : index
    %c0_15 = arith.constant 0 : index
    %12 = vector.load %arg4[%c5, %c0_15] : memref<48x128xf32, #tpu.memory_space<vmem>>, vector<1x64xf32>
    %c6 = arith.constant 6 : index
    %c0_16 = arith.constant 0 : index
    %13 = vector.load %arg4[%c6, %c0_16] : memref<48x128xf32, #tpu.memory_space<vmem>>, vector<1x32xf32>
    %c7 = arith.constant 7 : index
    %c0_17 = arith.constant 0 : index
    %14 = vector.load %arg4[%c7, %c0_17] : memref<48x128xf32, #tpu.memory_space<vmem>>, vector<1x32xf32>
    %c8 = arith.constant 8 : index
    %c0_18 = arith.constant 0 : index
    %15 = vector.load %arg4[%c8, %c0_18] : memref<48x128xf32, #tpu.memory_space<vmem>>, vector<1x32xf32>
    %c9 = arith.constant 9 : index
    %c0_19 = arith.constant 0 : index
    %16 = vector.load %arg4[%c9, %c0_19] : memref<48x128xf32, #tpu.memory_space<vmem>>, vector<1x32xf32>
    %c10 = arith.constant 10 : index
    %c0_20 = arith.constant 0 : index
    %17 = vector.load %arg4[%c10, %c0_20] : memref<48x128xf32, #tpu.memory_space<vmem>>, vector<1x32xf32>
    %c11 = arith.constant 11 : index
    %c0_21 = arith.constant 0 : index
    %18 = vector.load %arg4[%c11, %c0_21] : memref<48x128xf32, #tpu.memory_space<vmem>>, vector<1x1xf32>
    %c12 = arith.constant 12 : index
    %c0_22 = arith.constant 0 : index
    %19 = vector.load %arg4[%c12, %c0_22] : memref<48x128xf32, #tpu.memory_space<vmem>>, vector<1x1xf32>
    %c16 = arith.constant 16 : index
    %c0_23 = arith.constant 0 : index
    %20 = vector.load %arg4[%c16, %c0_23] : memref<48x128xf32, #tpu.memory_space<vmem>>, vector<16x4xf32>
    %c32_24 = arith.constant 32 : index
    %c0_25 = arith.constant 0 : index
    %21 = vector.load %arg4[%c32_24, %c0_25] : memref<48x128xf32, #tpu.memory_space<vmem>>, vector<2x16xf32>
    %c40 = arith.constant 40 : index
    %c0_26 = arith.constant 0 : index
    %22 = vector.load %arg4[%c40, %c0_26] : memref<48x128xf32, #tpu.memory_space<vmem>>, vector<4x16xf32>
    %cst = arith.constant dense<0.000000e+00> : vector<16x64xf32>
    %23 = tpu.matmul %1, %2, %cst {dimension_numbers = #tpu.dot_dimension_numbers<[1], [0], [0], [1], [0, 0, 1, 1], [], []>} : vector<16x32xf32>, vector<32x64xf32>, vector<16x64xf32> -> vector<16x64xf32>
    %24 = vector.broadcast %7 : vector<1x64xf32> to vector<16x64xf32>
    %25 = arith.addf %23, %24 : vector<16x64xf32>
    %cst_27 = arith.constant dense<0.000000e+00> : vector<128x64xf32>
    %26 = tpu.matmul %0, %3, %cst_27 {dimension_numbers = #tpu.dot_dimension_numbers<[1], [0], [0], [1], [0, 0, 1, 1], [], []>} : vector<128x32xf32>, vector<32x64xf32>, vector<128x64xf32> -> vector<128x64xf32>
    %27 = vector.broadcast %8 : vector<1x64xf32> to vector<128x64xf32>
    %28 = arith.addf %26, %27 : vector<128x64xf32>
    %29 = vector.shape_cast %28 : vector<128x64xf32> to vector<16x8x64xf32>
    %30 = vector.shape_cast %25 : vector<16x64xf32> to vector<16x1x64xf32>
    %31 = vector.broadcast %30 : vector<16x1x64xf32> to vector<16x8x64xf32>
    %32 = arith.mulf %31, %29 : vector<16x8x64xf32>
    %cst_28 = arith.constant dense<0.000000e+00> : vector<16x8xf32>
    %33 = vector.multi_reduction <add>, %32, %cst_28 [2] : vector<16x8x64xf32> to vector<16x8xf32>
    %cst_29 = arith.constant 0.176776692 : f32
    %34 = vector.broadcast %cst_29 : f32 to vector<16x8xf32>
    %35 = arith.mulf %33, %34 : vector<16x8xf32>
    %c0_30 = arith.constant 0 : index
    %c0_31 = arith.constant 0 : index
    %36 = vector.load %arg2[%c0_30, %c0_31] : memref<16x8xf32, #tpu.memory_space<vmem>>, vector<16x8xf32>
    %37 = arith.addf %35, %36 : vector<16x8xf32>
    %cst_32 = arith.constant dense<0xFF800000> : vector<16xf32>
    %38 = vector.multi_reduction <maximumf>, %37, %cst_32 [1] : vector<16x8xf32> to vector<16xf32>
    %39 = vector.shape_cast %38 : vector<16xf32> to vector<16x1xf32>
    %40 = vector.broadcast %39 : vector<16x1xf32> to vector<16x8xf32>
    %41 = arith.subf %37, %40 : vector<16x8xf32>
    %42 = math.exp %41 : vector<16x8xf32>
    %cst_33 = arith.constant dense<0.000000e+00> : vector<16xf32>
    %43 = vector.multi_reduction <add>, %42, %cst_33 [1] : vector<16x8xf32> to vector<16xf32>
    %44 = vector.shape_cast %43 : vector<16xf32> to vector<16x1xf32>
    %45 = tpu.reciprocal %44 {approx = true} : vector<16x1xf32> -> vector<16x1xf32>
    %46 = vector.broadcast %45 : vector<16x1xf32> to vector<16x8xf32>
    %47 = arith.mulf %42, %46 : vector<16x8xf32>
    %48 = vector.shape_cast %47 : vector<16x8xf32> to vector<16x8x1xf32>
    %49 = vector.broadcast %48 : vector<16x8x1xf32> to vector<16x8x64xf32>
    %50 = arith.mulf %49, %29 : vector<16x8x64xf32>
    %cst_34 = arith.constant dense<0.000000e+00> : vector<16x64xf32>
    %51 = vector.multi_reduction <add>, %50, %cst_34 [1] : vector<16x8x64xf32> to vector<16x64xf32>
    %cst_35 = arith.constant dense<0.000000e+00> : vector<16x32xf32>
    %52 = tpu.matmul %51, %4, %cst_35 {dimension_numbers = #tpu.dot_dimension_numbers<[1], [0], [0], [1], [0, 0, 1, 1], [], []>} : vector<16x64xf32>, vector<64x32xf32>, vector<16x32xf32> -> vector<16x32xf32>
    %53 = vector.broadcast %9 : vector<1x32xf32> to vector<16x32xf32>
    %54 = arith.addf %52, %53 : vector<16x32xf32>
    %55 = arith.addf %1, %54 : vector<16x32xf32>
    %cst_36 = arith.constant dense<0.000000e+00> : vector<16xf32>
    %56 = vector.multi_reduction <add>, %55, %cst_36 [1] : vector<16x32xf32> to vector<16xf32>
    %57 = vector.shape_cast %56 : vector<16xf32> to vector<16x1xf32>
    %cst_37 = arith.constant 3.200000e+01 : f32
    %58 = vector.broadcast %cst_37 : f32 to vector<16x1xf32>
    %59 = arith.divf %57, %58 : vector<16x1xf32>
    %60 = vector.broadcast %59 : vector<16x1xf32> to vector<16x32xf32>
    %61 = arith.subf %55, %60 : vector<16x32xf32>
    %62 = arith.mulf %61, %61 : vector<16x32xf32>
    %cst_38 = arith.constant dense<0.000000e+00> : vector<16xf32>
    %63 = vector.multi_reduction <add>, %62, %cst_38 [1] : vector<16x32xf32> to vector<16xf32>
    %64 = vector.shape_cast %63 : vector<16xf32> to vector<16x1xf32>
    %cst_39 = arith.constant 3.200000e+01 : f32
    %65 = vector.broadcast %cst_39 : f32 to vector<16x1xf32>
    %66 = arith.divf %64, %65 : vector<16x1xf32>
    %cst_40 = arith.constant 9.99999974E-6 : f32
    %67 = vector.broadcast %cst_40 : f32 to vector<16x1xf32>
    %68 = arith.addf %66, %67 : vector<16x1xf32>
    %69 = math.rsqrt %68 : vector<16x1xf32>
    %70 = vector.broadcast %69 : vector<16x1xf32> to vector<16x32xf32>
    %71 = arith.mulf %61, %70 : vector<16x32xf32>
    %72 = vector.broadcast %10 : vector<1x32xf32> to vector<16x32xf32>
    %73 = arith.mulf %71, %72 : vector<16x32xf32>
    %74 = vector.broadcast %11 : vector<1x32xf32> to vector<16x32xf32>
    %75 = arith.addf %73, %74 : vector<16x32xf32>
    %cst_41 = arith.constant dense<0.000000e+00> : vector<16x64xf32>
    %76 = tpu.matmul %75, %5, %cst_41 {dimension_numbers = #tpu.dot_dimension_numbers<[1], [0], [0], [1], [0, 0, 1, 1], [], []>} : vector<16x32xf32>, vector<32x64xf32>, vector<16x64xf32> -> vector<16x64xf32>
    %77 = vector.broadcast %12 : vector<1x64xf32> to vector<16x64xf32>
    %78 = arith.addf %76, %77 : vector<16x64xf32>
    %79 = arith.mulf %78, %78 : vector<16x64xf32>
    %80 = arith.mulf %78, %79 : vector<16x64xf32>
    %cst_42 = arith.constant 4.471500e-02 : f32
    %81 = vector.broadcast %cst_42 : f32 to vector<16x64xf32>
    %82 = arith.mulf %81, %80 : vector<16x64xf32>
    %83 = arith.addf %78, %82 : vector<16x64xf32>
    %cst_43 = arith.constant 0.797884583 : f32
    %84 = vector.broadcast %cst_43 : f32 to vector<16x64xf32>
    %85 = arith.mulf %84, %83 : vector<16x64xf32>
    %86 = math.tanh %85 : vector<16x64xf32>
    %cst_44 = arith.constant 1.000000e+00 : f32
    %87 = vector.broadcast %cst_44 : f32 to vector<16x64xf32>
    %88 = arith.addf %87, %86 : vector<16x64xf32>
    %cst_45 = arith.constant 5.000000e-01 : f32
    %89 = vector.broadcast %cst_45 : f32 to vector<16x64xf32>
    %90 = arith.mulf %89, %88 : vector<16x64xf32>
    %91 = arith.mulf %78, %90 : vector<16x64xf32>
    %cst_46 = arith.constant dense<0.000000e+00> : vector<16x32xf32>
    %92 = tpu.matmul %91, %6, %cst_46 {dimension_numbers = #tpu.dot_dimension_numbers<[1], [0], [0], [1], [0, 0, 1, 1], [], []>} : vector<16x64xf32>, vector<64x32xf32>, vector<16x32xf32> -> vector<16x32xf32>
    %93 = vector.broadcast %13 : vector<1x32xf32> to vector<16x32xf32>
    %94 = arith.addf %92, %93 : vector<16x32xf32>
    %95 = arith.addf %75, %94 : vector<16x32xf32>
    %cst_47 = arith.constant dense<0.000000e+00> : vector<16xf32>
    %96 = vector.multi_reduction <add>, %95, %cst_47 [1] : vector<16x32xf32> to vector<16xf32>
    %97 = vector.shape_cast %96 : vector<16xf32> to vector<16x1xf32>
    %cst_48 = arith.constant 3.200000e+01 : f32
    %98 = vector.broadcast %cst_48 : f32 to vector<16x1xf32>
    %99 = arith.divf %97, %98 : vector<16x1xf32>
    %100 = vector.broadcast %99 : vector<16x1xf32> to vector<16x32xf32>
    %101 = arith.subf %95, %100 : vector<16x32xf32>
    %102 = arith.mulf %101, %101 : vector<16x32xf32>
    %cst_49 = arith.constant dense<0.000000e+00> : vector<16xf32>
    %103 = vector.multi_reduction <add>, %102, %cst_49 [1] : vector<16x32xf32> to vector<16xf32>
    %104 = vector.shape_cast %103 : vector<16xf32> to vector<16x1xf32>
    %cst_50 = arith.constant 3.200000e+01 : f32
    %105 = vector.broadcast %cst_50 : f32 to vector<16x1xf32>
    %106 = arith.divf %104, %105 : vector<16x1xf32>
    %cst_51 = arith.constant 9.99999974E-6 : f32
    %107 = vector.broadcast %cst_51 : f32 to vector<16x1xf32>
    %108 = arith.addf %106, %107 : vector<16x1xf32>
    %109 = math.rsqrt %108 : vector<16x1xf32>
    %110 = vector.broadcast %109 : vector<16x1xf32> to vector<16x32xf32>
    %111 = arith.mulf %101, %110 : vector<16x32xf32>
    %112 = vector.broadcast %14 : vector<1x32xf32> to vector<16x32xf32>
    %113 = arith.mulf %111, %112 : vector<16x32xf32>
    %114 = vector.broadcast %15 : vector<1x32xf32> to vector<16x32xf32>
    %115 = arith.addf %113, %114 : vector<16x32xf32>
    %116 = vector.broadcast %16 : vector<1x32xf32> to vector<16x32xf32>
    %117 = arith.mulf %115, %116 : vector<16x32xf32>
    %cst_52 = arith.constant dense<0.000000e+00> : vector<16xf32>
    %118 = vector.multi_reduction <add>, %117, %cst_52 [1] : vector<16x32xf32> to vector<16xf32>
    %119 = vector.shape_cast %118 : vector<16xf32> to vector<16x1xf32>
    %120 = vector.broadcast %119 : vector<16x1xf32> to vector<16x4xf32>
    %121 = arith.mulf %120, %20 : vector<16x4xf32>
    %cst_53 = arith.constant dense<0.000000e+00> : vector<2x4xf32>
    %122 = tpu.matmul %21, %121, %cst_53 {dimension_numbers = #tpu.dot_dimension_numbers<[1], [0], [0], [1], [0, 0, 1, 1], [], []>} : vector<2x16xf32>, vector<16x4xf32>, vector<2x4xf32> -> vector<2x4xf32>
    %cst_54 = arith.constant 5.000000e-01 : f32
    %123 = vector.broadcast %cst_54 : f32 to vector<2x4xf32>
    %124 = arith.mulf %122, %123 : vector<2x4xf32>
    %125 = vector.broadcast %18 : vector<1x1xf32> to vector<2x4xf32>
    %126 = arith.addf %124, %125 : vector<2x4xf32>
    %c0_55 = arith.constant 0 : index
    %c0_56 = arith.constant 0 : index
    %127 = vector.load %arg5[%c0_55, %c0_56] : memref<2x4xf32, #tpu.memory_space<vmem>>, vector<2x4xf32>
    %128 = arith.addf %126, %127 : vector<2x4xf32>
    %cst_57 = arith.constant dense<0xFF800000> : vector<2xf32>
    %129 = vector.multi_reduction <maximumf>, %128, %cst_57 [1] : vector<2x4xf32> to vector<2xf32>
    %130 = vector.shape_cast %129 : vector<2xf32> to vector<2x1xf32>
    %131 = vector.broadcast %130 : vector<2x1xf32> to vector<2x4xf32>
    %132 = arith.subf %128, %131 : vector<2x4xf32>
    %133 = math.exp %132 : vector<2x4xf32>
    %cst_58 = arith.constant dense<0.000000e+00> : vector<2xf32>
    %134 = vector.multi_reduction <add>, %133, %cst_58 [1] : vector<2x4xf32> to vector<2xf32>
    %135 = vector.shape_cast %134 : vector<2xf32> to vector<2x1xf32>
    %136 = tpu.reciprocal %135 {approx = true} : vector<2x1xf32> -> vector<2x1xf32>
    %137 = vector.broadcast %136 : vector<2x1xf32> to vector<2x4xf32>
    %138 = arith.mulf %133, %137 : vector<2x4xf32>
    %c0_59 = arith.constant 0 : index
    %c0_60 = arith.constant 0 : index
    %139 = vector.load %arg6[%c0_59, %c0_60] : memref<2x4xf32, #tpu.memory_space<vmem>>, vector<2x4xf32>
    %140 = arith.mulf %138, %139 : vector<2x4xf32>
    %cst_61 = arith.constant dense<0.000000e+00> : vector<2xf32>
    %141 = vector.multi_reduction <add>, %140, %cst_61 [1] : vector<2x4xf32> to vector<2xf32>
    %142 = vector.shape_cast %141 : vector<2xf32> to vector<2x1xf32>
    %cst_62 = arith.constant 9.99999971E-10 : f32
    %143 = vector.broadcast %cst_62 : f32 to vector<2x1xf32>
    %144 = arith.maximumf %142, %143 : vector<2x1xf32>
    %145 = tpu.reciprocal %144 {approx = true} : vector<2x1xf32> -> vector<2x1xf32>
    %146 = vector.broadcast %145 : vector<2x1xf32> to vector<2x4xf32>
    %147 = arith.mulf %140, %146 : vector<2x4xf32>
    %cst_63 = arith.constant dense<0.000000e+00> : vector<2x16xf32>
    %148 = tpu.matmul %147, %22, %cst_63 {dimension_numbers = #tpu.dot_dimension_numbers<[1], [0], [0], [1], [0, 0, 1, 1], [], []>} : vector<2x4xf32>, vector<4x16xf32>, vector<2x16xf32> -> vector<2x16xf32>
    %149 = arith.mulf %148, %21 : vector<2x16xf32>
    %cst_64 = arith.constant 5.000000e-01 : f32
    %150 = vector.broadcast %cst_64 : f32 to vector<2x16xf32>
    %151 = arith.mulf %149, %150 : vector<2x16xf32>
    %cst_65 = arith.constant dense<0.000000e+00> : vector<2x32xf32>
    %152 = tpu.matmul %151, %115, %cst_65 {dimension_numbers = #tpu.dot_dimension_numbers<[1], [0], [0], [1], [0, 0, 1, 1], [], []>} : vector<2x16xf32>, vector<16x32xf32>, vector<2x32xf32> -> vector<2x32xf32>
    %153 = vector.broadcast %17 : vector<1x32xf32> to vector<2x32xf32>
    %154 = arith.mulf %152, %153 : vector<2x32xf32>
    %cst_66 = arith.constant dense<0.000000e+00> : vector<2xf32>
    %155 = vector.multi_reduction <add>, %154, %cst_66 [1] : vector<2x32xf32> to vector<2xf32>
    %156 = vector.shape_cast %155 : vector<2xf32> to vector<2x1xf32>
    %157 = vector.broadcast %19 : vector<1x1xf32> to vector<2x1xf32>
    %158 = arith.addf %156, %157 : vector<2x1xf32>
    %cst_67 = arith.constant 0.000000e+00 : f32
    %159 = vector.broadcast %cst_67 : f32 to vector<2x1xf32>
    %160 = arith.subf %159, %158 : vector<2x1xf32>
    %161 = math.exp %160 : vector<2x1xf32>
    %cst_68 = arith.constant 1.000000e+00 : f32
    %162 = vector.broadcast %cst_68 : f32 to vector<2x1xf32>
    %163 = arith.addf %162, %161 : vector<2x1xf32>
    %cst_69 = arith.constant 1.000000e+00 : f32
    %164 = vector.broadcast %cst_69 : f32 to vector<2x1xf32>
    %165 = arith.divf %164, %163 : vector<2x1xf32>
    %c0_70 = arith.constant 0 : index
    %c0_71 = arith.constant 0 : index
    %166 = vector.load %arg7[%c0_70, %c0_71] : memref<2x1xf32, #tpu.memory_space<vmem>>, vector<2x1xf32>
    tpu.vector_store %arg7[%c0_70, %c0_71], %165 {strides = array<i32>} : memref<2x1xf32, #tpu.memory_space<vmem>>, vector<2x1xf32>,
    return
  }
}

</mosaic_0001>

<bundles_post_ra>
// kernel: forward.1
= control target key start
LH: loop header
LB: loop body
LE: loop exit
PB: predicated region body
PF: predicated region fallthrough
CT: control target
= control target key end

     0   :  { %v378_v0 = vlaneseq  ;;  %vm93_vm0 = vcmask 261120   ;;  %v2485_v52 = vmov 1966171168   ;;  %vm568_vm1 = vcmask 523264   ;;  %s3256_s3 = inlined_call_operand.vmem [shape: f32[224,64], index: 3, kind: input, shape index: {}]   ;;  %s3257_s1 = inlined_call_operand.vmem [shape: f32[16,32], index: 1, kind: input, shape index: {}]   ;;  %s3258_s0 = inlined_call_operand.vmem [shape: f32[128,32], index: 0, kind: input, shape index: {}]   ;;  %s3259_s2 = inlined_call_operand.vmem [shape: f32[16,8], index: 2, kind: input, shape index: {}]   ;;  %s3260_s4 = inlined_call_operand.vmem [shape: f32[48,128], index: 4, kind: input, shape index: {}]   ;;  %s3261_s5 = inlined_call_operand.vmem [shape: f32[2,4], index: 5, kind: input, shape index: {}]   ;;  %s3262_s6 = inlined_call_operand.vmem [shape: f32[2,4], index: 6, kind: input, shape index: {}]   ;;  %s3263_s7 = inlined_call_operand.vmem [shape: f32[2,1], index: 7, kind: output, shape index: {}]  }
   0x1   :  { %v47_v1 = vld [vmem:[%s3256_s3 + $0x18] sm:$0xff]  ;;  %v46_v3 = vld [vmem:[%s3256_s3 + $0x10] sm:$0xff]  ;;  %v45_v6 = vld [vmem:[%s3256_s3 + $0x8] sm:$0xff]  ;;  %v376_v53 = vunpack.c.l.s4 %v2485_v52  ;;  %vm911_vm2 = vcmask 1041409   ;;  %vm913_vm3 = vcmask 1042434   ;;  %vm915_vm4 = vcmask 1043459  }
   0x2   :  { %v51_v2 = vld [vmem:[%s3256_s3 + $0x38] sm:$0xff]  ;;  %2306 = vmatprep.subr.mxu0 %v47_v1  ;;  %v50_v4 = vld [vmem:[%s3256_s3 + $0x30] sm:$0xff]  ;;  %v2542_v5 = vshrl.u32 %v378_v0, 7  ;;  %v49_v7 = vld [vmem:[%s3256_s3 + $0x28] sm:$0xff]  ;;  %vm917_vm5 = vcmask 1044484   ;;  %vm919_vm6 = vcmask 1045509  }
   0x3   :  { %2317 = vmatprep.subr.mxu1 %v51_v2  ;;  %2307 = vmatpush3.msra.mxu0 %v47_v1  ;;  %v44_v8 = vld [vmem:[%s3256_s3] sm:$0xff]  ;;  %v43_v13 = vld [vmem:[%s3257_s1 + $0x8] sm:$0xff]  ;;  %v28_v17 = vld [vmem:[%s3258_s0 + $0x10] sm:$0xff]  ;;  %v377_v54 = vunpack.c.0.s8 %v376_v53  ;;  %vm921_vm7 = vcmask 1046534   ;;  %vm923_vm8 = vcmask 1047559   ;;  %vm934_vm9 = vcmask 64512  }
   0x4   :  { %2318 = vmatpush3.msra.mxu1 %v51_v2  ;;  %2308 = vmatprep.subr.mxu0 %v46_v3  ;;  %v48_v9 = vld [vmem:[%s3256_s3 + $0x20] sm:$0xff]  ;;  %v2560_v11 = vsub.s32 1, %v2542_v5  ;;  %v27_v14 = vld [vmem:[%s3258_s0 + $0x8] sm:$0xff]  ;;  %v2572_v15 = vsub.s32 0, %v2542_v5  ;;  %v2575_v16 = vsub.s32 2, %v2542_v5  ;;  %v29_v21 = vld [vmem:[%s3258_s0 + $0x18] sm:$0xff] }
   0x5   :  { %2319 = vmatprep.subr.mxu1 %v50_v4  ;;  %2309 = vmatpush3.msra.mxu0 %v46_v3  ;;  %v42_v10 = vld [vmem:[%s3257_s1] sm:$0xff]  ;;  %v2602_v23 = vld [vmem:[%s3259_s2 + $0x8] sm:$0xff]  ;;  %v2617_v28 = vsub.s32 3, %v2542_v5  ;;  %v32_v29 = vld [vmem:[%s3258_s0 + $0x30] sm:$0xff]  ;;  %v2632_v33 = vsub.s32 4, %v2542_v5  ;;  %v2647_v38 = vsub.s32 5, %v2542_v5  ;;  %v2694_v59 = vsub.s32 %v377_v54, %v2542_v5 }
   0x6   :  { %2320 = vmatpush3.msra.mxu1 %v50_v4  ;;  %2310 = vmatprep.subr.mxu0 %v45_v6  ;;  %v26_v12 = vld [vmem:[%s3258_s0] sm:$0xff]  ;;  %v703_v25 = vrot.slane %v2602_v23, %v2560_v11  ;;  %v31_v26 = vld [vmem:[%s3258_s0 + $0x28] sm:$0xff]  ;;  %v696_v27 = vrot.slane %v2602_v23, %v2572_v15  ;;  %v710_v30 = vrot.slane %v2602_v23, %v2575_v16  ;;  %v33_v31 = vld [vmem:[%s3258_s0 + $0x38] sm:$0xff]  ;;  %v2662_v43 = vsub.s32 6, %v2542_v5 }
   0x7   :  { %2321 = vmatprep.subr.mxu1 %v49_v7  ;;  %2311 = vmatpush3.msra.mxu0 %v45_v6  ;;  %v2584_v18 = vld [vmem:[%s3259_s2] sm:$0xff]  ;;  %v717_v35 = vrot.slane %v2602_v23, %v2617_v28  ;;  %v35_v36 = vld [vmem:[%s3258_s0 + $0x48] sm:$0xff]  ;;  %v36_v39 = vld [vmem:[%s3258_s0 + $0x50] sm:$0xff]  ;;  %v724_v40 = vrot.slane %v2602_v23, %v2632_v33  ;;  %v731_v45 = vrot.slane %v2602_v23, %v2647_v38  ;;  %v2677_v48 = vsub.s32 7, %v2542_v5 }
   0x8   :  { %2322 = vmatpush3.msra.mxu1 %v49_v7  ;;  %2312 = vmatprep.subr.mxu0 %v44_v8  ;;  %v647_v19 = vrot.slane %v2584_v18, %v2560_v11  ;;  %v640_v20 = vrot.slane %v2584_v18, %v2572_v15  ;;  %v654_v22 = vrot.slane %v2584_v18, %v2575_v16  ;;  %v30_v24 = vld [vmem:[%s3258_s0 + $0x20] sm:$0xff]  ;;  %v37_v41 = vld [vmem:[%s3258_s0 + $0x58] sm:$0xff]  ;;  %v39_v46 = vld [vmem:[%s3258_s0 + $0x68] sm:$0xff]  ;;  %vm2488_vm10 = vmmov 0  }
   0x9   :  { %2323 = vmatprep.subr.mxu1 %v48_v9  ;;  %2313 = vmatpush3.msra.mxu0 %v44_v8  ;;  %v661_v32 = vrot.slane %v2584_v18, %v2617_v28  ;;  %v34_v34 = vld [vmem:[%s3258_s0 + $0x40] sm:$0xff]  ;;  %v668_v37 = vrot.slane %v2584_v18, %v2632_v33  ;;  %v675_v42 = vrot.slane %v2584_v18, %v2647_v38  ;;  %v40_v49 = vld [vmem:[%s3258_s0 + $0x70] sm:$0xff]  ;;  %v41_v50 = vld [vmem:[%s3258_s0 + $0x78] sm:$0xff]  ;;  %vm1925_vm11 = vcmask 130048  }
   0xa   :  { %2314 = vmatprep.mubr.msk.f32.mxu0 %vm93_vm0, %v42_v10  ;;  %2324 = vmatpush3.msra.mxu1 %v48_v9  ;;  %v38_v44 = vld [vmem:[%s3258_s0 + $0x60] sm:$0xff]  ;;  %v682_v47 = vrot.slane %v2584_v18, %v2662_v43  ;;  %v689_v51 = vrot.slane %v2584_v18, %v2677_v48  ;;  %vm2007_vm12 = vcmask 25600   ;;  %vm2031_vm13 = vcmask 1043456  }
   0xb   :  { %2325 = vmatprep.mubr.msk.f32.mxu1 %vm93_vm0, %v26_v12  ;;  %2315 = vmatmul.mubr.msk.f32.vlgmr.msra.gmra.mxu0 %vm93_vm0, %v43_v13  ;;  %v2206_v55 = vld [vmem:[%s3260_s4] ss:$0 sm:$0xff]  ;;  %v2700_v3 = vld [vmem:[%s3260_s4 + $0x1] ss:$0 sm:$0xff]  ;;  %vm2027_vm14 = vcmask 31744   ;;  %vm2185_vm15 = vcmask 254976  }
   0xc   :  { %2326 = vmatmul.mubr.msk.f32.vlgmr.msra.gmra.mxu1 %vm93_vm0, %v27_v14  ;;  %649 = vbcast.lane.b32.xlu1 %v647_v19, 256 }
   0xd   :  { %2328 = vmatprep.mubr.msk.f32.mxu1 %vm93_vm0, %v28_v17  ;;  %642 = vbcast.lane.b32.xlu0 %v640_v20, 256 }
  0x10   :  { %2329 = vmatmul.mubr.msk.f32.gmra.mxu1 %vm93_vm0, %v29_v21  ;;  %656 = vbcast.lane.b32.xlu1 %v654_v22, 256 }
  0x11   :  { %2331 = vmatprep.mubr.msk.f32.mxu1 %vm93_vm0, %v30_v24  ;;  %705 = vbcast.lane.b32.xlu0 %v703_v25, 256 }
  0x14   :  { %2332 = vmatmul.mubr.msk.f32.gmra.mxu1 %vm93_vm0, %v31_v26  ;;  %698 = vbcast.lane.b32.xlu1 %v696_v27, 256 }
  0x15   :  { %2334 = vmatprep.mubr.msk.f32.mxu1 %vm93_vm0, %v32_v29  ;;  %712 = vbcast.lane.b32.xlu0 %v710_v30, 256 }
  0x18   :  { %2335 = vmatmul.mubr.msk.f32.gmra.mxu1 %vm93_vm0, %v33_v31  ;;  %663 = vbcast.lane.b32.xlu1 %v661_v32, 256 }
  0x19   :  { %2337 = vmatprep.mubr.msk.f32.mxu1 %vm93_vm0, %v34_v34  ;;  %719 = vbcast.lane.b32.xlu0 %v717_v35, 256 }
  0x1c   :  { %2338 = vmatmul.mubr.msk.f32.gmra.mxu1 %vm93_vm0, %v35_v36  ;;  %670 = vbcast.lane.b32.xlu1 %v668_v37, 256 }
  0x1d   :  { %2340 = vmatprep.mubr.msk.f32.mxu1 %vm93_vm0, %v36_v39  ;;  %726 = vbcast.lane.b32.xlu0 %v724_v40, 256 }
  0x20   :  { %2341 = vmatmul.mubr.msk.f32.gmra.mxu1 %vm93_vm0, %v37_v41  ;;  %677 = vbcast.lane.b32.xlu1 %v675_v42, 256 }
  0x21   :  { %2343 = vmatprep.mubr.msk.f32.mxu1 %vm93_vm0, %v38_v44  ;;  %733 = vbcast.lane.b32.xlu0 %v731_v45, 256 }
  0x24   :  { %2344 = vmatmul.mubr.msk.f32.gmra.mxu1 %vm93_vm0, %v39_v46  ;;  %684 = vbcast.lane.b32.xlu1 %v682_v47, 256 }
  0x25   :  { %2346 = vmatprep.mubr.msk.f32.mxu1 %vm93_vm0, %v40_v49 }
  0x28   :  { %2347 = vmatmul.mubr.msk.f32.gmra.mxu1 %vm93_vm0, %v41_v50  ;;  %691 = vbcast.lane.b32.xlu1 %v689_v51, 256 }
  0xcb   :  { %v2316_v56 = vpop.f32.mrf.mxu0 }
  0xcc   :  { %v2327_v57 = vpop.f32.mrf.mxu1  ;;  %v172_v58 = vadd.f32 %v2316_v56, %v2206_v55 }
  0xcd   :  { %v166_v60 = vpop.f32.mrf.mxu0  ;;  %v2706_v14 = vadd.f32 %v2327_v57, %v2700_v3 }
  0xce   :  { %v293_v61 = vpop.f32.mrf.mxu1  ;;  %v167_v62 = vadd.f32 %v2206_v55, %v166_v60  ;;  %v430_v1 = vrot.slane %v172_v58, %v2694_v59  ;;  %v423_v12 = vcombine.high %v172_v58, %v172_v58 }
  0xcf   :  { %v2712_v18 = vadd.f32 %v2700_v3, %v293_v61 }
  0xd0   :  { %v2330_v63 = vpop.f32.mrf.mxu1  ;;  %v374_v2 = vcombine.high %v167_v62, %v167_v62  ;;  %v381_v4 = vrot.slane %v167_v62, %v2694_v59  ;;  %v438_v13 = vcombine.high %v430_v1, %v430_v1  ;;  %v437_v41 = vrot.slane %v423_v12, %v2694_v59 }
  0xd1   :  { %v2733_v42 = vrot.slane %v430_v1, %v2694_v59  ;;  %v2744_v53 = vadd.f32 %v2330_v63, %v2700_v3 }
  0xd2   :  { %v303_v6 = vpop.f32.mrf.mxu1  ;;  %v388_v7 = vrot.slane %v374_v2, %v2694_v59  ;;  %v389_v8 = vcombine.high %v381_v4, %v381_v4  ;;  %v397_v9 = vrot.slane %v381_v4, %v2694_v59  ;;  %v460_v35 = vrot.slane %v438_v13, %v2694_v59 }
  0xd3   :  { %v2717_v25 = vadd.f32 %v2700_v3, %v303_v6  ;;  %v439_v56 = vcombine.high %v437_v41, %v437_v41  ;;  %v468_v58 = vcombine.high %v2733_v42, %v2733_v42 }
  0xd4   :  { %v2333_v10 = vpop.f32.mrf.mxu1  ;;  %v2709_v17 = vrot.slane %v388_v7, %v2694_v59  ;;  %v475_v20 = vrot.slane %v397_v9, %v2572_v15  ;;  %v419_v21 = vcombine.high %v397_v9, %v397_v9  ;;  %v411_v22 = vrot.slane %v389_v8, %v2694_v59 }
  0xd5   :  { %v390_v24 = vcombine.high %v388_v7, %v388_v7  ;;  %v511_v51 = vrot.slane %v460_v35, %v2572_v15  ;;  %v470_v52 = vcombine.high %v460_v35, %v460_v35  ;;  %v2751_v60 = vadd.f32 %v2333_v10, %v2700_v3 }
  0xd6   :  { %v313_v19 = vpop.f32.mrf.mxu1  ;;  %v491_v27 = vrot.slane %v2709_v17, %v2572_v15  ;;  %v552_v30 = vmul.f32 %v475_v20, %v2712_v18  ;;  %v483_v31 = vrot.slane %v419_v21, %v2572_v15  ;;  %v479_v32 = vrot.slane %v411_v22, %v2572_v15 }
  0xd7   :  { %v2720_v26 = vadd.f32 %v2700_v3, %v313_v19  ;;  %v421_v34 = vcombine.high %v411_v22, %v411_v22  ;;  %v418_v49 = vrot.slane %v390_v24, %v2694_v59  ;;  %v519_v6 = vrot.slane %v470_v52, %v2572_v15 }
  0xd8   :  { %v2336_v29 = vpop.f32.mrf.mxu1  ;;  %v569_v37 = vsel %vm568_vm1, %v552_v30, 0.0  ;;  %v554_v39 = vmul.f32 %v483_v31, %v2717_v25  ;;  %v553_v40 = vmul.f32 %v479_v32, %v2706_v14  ;;  %v420_v8 = vcombine.high %v2709_v17, %v2709_v17 }
  0xd9   :  { %570 = vadd.xlane.f32.xlu0 %v569_v37  ;;  %v556_v46 = vmul.f32 %v491_v27, %v2720_v26  ;;  %v487_v47 = vrot.slane %v421_v34, %v2572_v15  ;;  %v495_v63 = vrot.slane %v418_v49, %v2572_v15  ;;  %v515_v13 = vrot.slane %v468_v58, %v2572_v15 }
  0xda   :  { %v323_v36 = vpop.f32.mrf.mxu1  ;;  %v575_v45 = vsel %vm568_vm1, %v554_v39, 0.0  ;;  %v572_v55 = vsel %vm568_vm1, %v553_v40, 0.0  ;;  %v467_v22 = vrot.slane %v439_v56, %v2694_v59  ;;  %v422_v24 = vcombine.high %v418_v49, %v418_v49 }
  0xdb   :  { %576 = vadd.xlane.f32.xlu1 %v575_v45  ;;  %v581_v62 = vsel %vm568_vm1, %v556_v46, 0.0  ;;  %v555_v1 = vmul.f32 %v487_v47, %v2744_v53  ;;  %v2764_v9 = vadd.f32 %v2700_v3, %v323_v36  ;;  %v557_v21 = vmul.f32 %v495_v63, %v2751_v60 }
  0xdc   :  { %v2339_v44 = vpop.f32.mrf.mxu1  ;;  %v499_v32 = vrot.slane %v420_v8, %v2572_v15  ;;  %v2781_v34 = vadd.f32 %v2336_v29, %v2700_v3  ;;  %v453_v35 = vrot.slane %v437_v41, %v2694_v59  ;;  %v527_v40 = vrot.slane %v467_v22, %v2572_v15 }
  0xdd   :  { %v2740_v50 = vadd.f32 %v2339_v44, %v2700_v3  ;;  %573 = vadd.xlane.f32.xlu0 %v572_v55  ;;  %v578_v20 = vsel %vm568_vm1, %v555_v1, 0.0  ;;  %v584_v37 = vsel %vm568_vm1, %v557_v21, 0.0  ;;  %v503_v44 = vrot.slane %v422_v24, %v2572_v15  ;;  %v650_v21 = vpop.permute.xlu1 %649  ;;  %v643_v24 = vpop.permute.xlu0 %642 }
  0xde   :  { %v333_v54 = vpop.f32.mrf.mxu1  ;;  %v558_v39 = vmul.f32 %v499_v32, %v2764_v9  ;;  %v2486_v47 = vmov 0   ;;  %v523_v41 = vrot.slane %v453_v35, %v2572_v15  ;;  %v469_v55 = vcombine.high %v453_v35, %v453_v35 }
  0xdf   :  { %v561_v57 = vmul.f32 %v511_v51, %v2740_v50  ;;  %582 = vadd.xlane.f32.xlu1 %v581_v62  ;;  %2423 = vset.pattern.permute.xlu0 %v2486_v47  ;;  %v2795_v49 = vadd.f32 %v2700_v3, %v333_v54  ;;  %v559_v52 = vmul.f32 %v503_v44, %v2781_v34 }
  0xe0   :  { %v2342_v61 = vpop.f32.mrf.mxu1  ;;  %2424 = vset.pattern.permute.xlu1 %v2486_v47  ;;  %v587_v51 = vsel %vm568_vm1, %v558_v39, 0.0  ;;  %v507_v56 = vrot.slane %v2733_v42, %v2572_v15  ;;  %v471_v62 = vcombine.high %v467_v22, %v467_v22 }
  0xe1   :  { %v2757_v2 = vadd.f32 %v2342_v61, %v2700_v3  ;;  %v596_v4 = vsel %vm568_vm1, %v561_v57, 0.0  ;;  %v590_v1 = vsel %vm568_vm1, %v559_v52, 0.0  ;;  %v657_v22 = vpop.permute.xlu1 %656 }
  0xe2   :  { %v343_v7 = vpop.f32.mrf.mxu1  ;;  %597 = vadd.xlane.f32.xlu0 %v596_v4  ;;  %v560_v63 = vmul.f32 %v507_v56, %v2795_v49  ;;  %v531_v4 = vrot.slane %v469_v55, %v2572_v15 }
  0xe3   :  { %v2767_v10 = vadd.f32 %v2700_v3, %v343_v7  ;;  %v563_v12 = vmul.f32 %v519_v6, %v2757_v2  ;;  %579 = vadd.xlane.f32.xlu1 %v578_v20  ;;  %v535_v7 = vrot.slane %v471_v62, %v2572_v15  ;;  %v738_v20 = vrot.slane %v2602_v23, %v2662_v43 }
  0xe4   :  { %v2345_v19 = vpop.f32.mrf.mxu1  ;;  %v593_v8 = vsel %vm568_vm1, %v560_v63, 0.0 }
  0xe5   :  { %v602_v17 = vsel %vm568_vm1, %v563_v12, 0.0  ;;  %v2776_v27 = vadd.f32 %v2345_v19, %v2700_v3  ;;  %v562_v31 = vmul.f32 %v515_v13, %v2767_v10  ;;  %v745_v19 = vrot.slane %v2602_v23, %v2677_v48 }
  0xe6   :  { %v353_v30 = vpop.f32.mrf.mxu1  ;;  %603 = vadd.xlane.f32.xlu0 %v602_v17  ;;  %v699_v17 = vpop.permute.xlu1 %698 }
  0xe7   :  { %585 = vadd.xlane.f32.xlu1 %v584_v37  ;;  %v2789_v45 = vadd.f32 %v2700_v3, %v353_v30  ;;  %v599_v46 = vsel %vm568_vm1, %v562_v31, 0.0  ;;  %v565_v29 = vmul.f32 %v527_v40, %v2776_v27  ;;  %v706_v30 = vpop.permute.xlu0 %705 }
  0xe8   :  { %v2348_v36 = vpop.f32.mrf.mxu1 }
  0xe9   :  { %v608_v58 = vsel %vm568_vm1, %v565_v29, 0.0  ;;  %v564_v61 = vmul.f32 %v523_v41, %v2789_v45  ;;  %v2807_v54 = vadd.f32 %v2348_v36, %v2700_v3 }
  0xea   :  { %v363_v59 = vpop.f32.mrf.mxu1  ;;  %600 = vadd.xlane.f32.xlu0 %v599_v46  ;;  %v664_v31 = vpop.permute.xlu1 %663 }
  0xeb   :  { %588 = vadd.xlane.f32.xlu1 %v587_v51  ;;  %v2802_v57 = vadd.f32 %v2700_v3, %v363_v59  ;;  %v605_v42 = vsel %vm568_vm1, %v564_v61, 0.0  ;;  %v567_v12 = vmul.f32 %v535_v7, %v2807_v54  ;;  %v713_v32 = vpop.permute.xlu0 %712 }
  0xed   :  { %v566_v6 = vmul.f32 %v531_v4, %v2802_v57  ;;  %v614_v13 = vsel %vm568_vm1, %v567_v12, 0.0 }
  0xee   :  { %609 = vadd.xlane.f32.xlu0 %v608_v58  ;;  %v671_v35 = vpop.permute.xlu1 %670 }
  0xef   :  { %591 = vadd.xlane.f32.xlu1 %v590_v1  ;;  %v611_v3 = vsel %vm568_vm1, %v566_v6, 0.0  ;;  %v720_v36 = vpop.permute.xlu0 %719 }
  0xf2   :  { %606 = vadd.xlane.f32.xlu0 %v605_v42  ;;  %v678_v37 = vpop.permute.xlu1 %677 }
  0xf3   :  { %594 = vadd.xlane.f32.xlu1 %v593_v8  ;;  %v727_v39 = vpop.permute.xlu0 %726 }
  0xf6   :  { %612 = vadd.xlane.f32.xlu0 %v611_v3  ;;  %v685_v40 = vpop.permute.xlu1 %684 }
  0xf7   :  { %615 = vadd.xlane.f32.xlu1 %v614_v13  ;;  %v734_v44 = vpop.permute.xlu0 %733 }
  0xfa   :  { %v692_v46 = vpop.permute.xlu1 %691 }
 0x108   :  { %747 = vbcast.lane.b32.xlu1 %v745_v19, 256 }
 0x10c   :  { %740 = vbcast.lane.b32.xlu0 %v738_v20, 256 }
 0x162   :  { %v571_v29 = vpop.xlane.xlu0 %570 }
 0x163   :  { %v617_v47 = vmul.f32 0.17677669, %v571_v29 }
 0x164   :  { %v577_v59 = vpop.xlane.xlu1 %576 }
 0x165   :  { %v2823_v23 = vadd.f32 %v643_v24, %v617_v47  ;;  %v619_v55 = vmul.f32 0.17677669, %v577_v59 }
 0x166   :  { %v574_v41 = vpop.xlane.xlu0 %573 }
 0x167   :  { %v618_v51 = vmul.f32 0.17677669, %v574_v41  ;;  %798 = vperm.xlu0 %2423, %v2823_v23   ;;  %v2831_v63 = vadd.f32 %v657_v22, %v619_v55 }
 0x168   :  { %v583_v52 = vpop.xlane.xlu1 %582 }
 0x169   :  { %v2826_v56 = vadd.f32 %v650_v21, %v618_v51  ;;  %v621_v58 = vmul.f32 0.17677669, %v583_v52 }
 0x16b   :  { %v598_v61 = vpop.xlane.xlu0 %597  ;;  %v2828_v62 = vadd.f32 %v671_v35, %v621_v58  ;;  %801 = vperm.xlu1 %2424, %v2826_v56  }
 0x16c   :  { %v580_v1 = vpop.xlane.xlu1 %579  ;;  %v626_v4 = vmul.f32 0.17677669, %v598_v61 }
 0x16d   :  { %v620_v42 = vmul.f32 0.17677669, %v580_v1  ;;  %810 = vperm.xlu0 %2423, %v2828_v62  }
 0x16e   :  { %v2837_v12 = vadd.f32 %v706_v30, %v626_v4 }
 0x16f   :  { %v604_v6 = vpop.xlane.xlu0 %603  ;;  %v2834_v7 = vadd.f32 %v664_v31, %v620_v42  ;;  %804 = vperm.xlu1 %2424, %v2831_v63  }
 0x170   :  { %v586_v8 = vpop.xlane.xlu1 %585  ;;  %v628_v3 = vmul.f32 0.17677669, %v604_v6 }
 0x171   :  { %v622_v13 = vmul.f32 0.17677669, %v586_v8  ;;  %807 = vperm.xlu0 %2423, %v2834_v7  }
 0x172   :  { %v2843_v22 = vadd.f32 %v720_v36, %v628_v3 }
 0x173   :  { %v601_v19 = vpop.xlane.xlu0 %600  ;;  %v2840_v20 = vadd.f32 %v678_v37, %v622_v13  ;;  %825 = vperm.xlu1 %2424, %v2837_v12  }
 0x174   :  { %v589_v21 = vpop.xlane.xlu1 %588  ;;  %v627_v24 = vmul.f32 0.17677669, %v601_v19 }
 0x175   :  { %v623_v31 = vmul.f32 0.17677669, %v589_v21  ;;  %813 = vperm.xlu0 %2423, %v2840_v20  }
 0x176   :  { %v2849_v47 = vadd.f32 %v713_v32, %v627_v24  ;;  %v846_v24 = vand.u32 127, %v378_v0 }
 0x177   :  { %v610_v35 = vpop.xlane.xlu0 %609  ;;  %v2846_v29 = vadd.f32 %v685_v40, %v623_v31  ;;  %831 = vperm.xlu1 %2424, %v2843_v22  }
 0x178   :  { %v592_v30 = vpop.xlane.xlu1 %591  ;;  %v630_v59 = vmul.f32 0.17677669, %v610_v35 }
 0x179   :  { %816 = vperm.xlu0 %2423, %v2846_v29   ;;  %v624_v58 = vmul.f32 0.17677669, %v592_v30  ;;  %v2873_v30 = vsub.s32 %v846_v24, %v2542_v5 }
 0x17a   :  { %v2853_v41 = vadd.f32 %v734_v44, %v630_v59 }
 0x17b   :  { %v607_v37 = vpop.xlane.xlu0 %606  ;;  %828 = vperm.xlu1 %2424, %v2849_v47   ;;  %v2861_v4 = vadd.f32 %v692_v46, %v624_v58 }
 0x17c   :  { %v595_v36 = vpop.xlane.xlu1 %594  ;;  %v629_v51 = vmul.f32 0.17677669, %v607_v37 }
 0x17d   :  { %v625_v52 = vmul.f32 0.17677669, %v595_v36 }
 0x17e   :  { %v2858_v32 = vadd.f32 %v727_v39, %v629_v51 }
 0x17f   :  { %v613_v55 = vpop.xlane.xlu0 %612  ;;  %v2855_v40 = vadd.f32 %v699_v17, %v625_v52  ;;  %837 = vperm.xlu1 %2424, %v2853_v41  }
 0x180   :  { %v616_v61 = vpop.xlane.xlu1 %615  ;;  %v631_v42 = vmul.f32 0.17677669, %v613_v55 }
 0x181   :  { %822 = vperm.xlu0 %2423, %v2855_v40   ;;  %v632_v6 = vmul.f32 0.17677669, %v616_v61 }
 0x183   :  { %v741_v1 = vpop.permute.xlu0 %740  ;;  %834 = vperm.xlu1 %2424, %v2858_v32  }
 0x184   :  { %v748_v44 = vpop.permute.xlu1 %747  ;;  %v2864_v8 = vadd.f32 %v741_v1, %v631_v42 }
 0x185   :  { %819 = vperm.xlu0 %2423, %v2861_v4   ;;  %v2867_v17 = vadd.f32 %v748_v44, %v632_v6 }
 0x187   :  { %840 = vperm.xlu1 %2424, %v2864_v8  }
 0x189   :  { %843 = vperm.xlu0 %2423, %v2867_v17  }
 0x1e2   :  { %v799_v39 = vpop.permute.xlu0 %798 }
 0x1e3   :  { %v850_v51 = vrot.slane %v799_v39, %v2873_v30 }
 0x1e6   :  { %v802_v3 = vpop.permute.xlu1 %801 }
 0x1e7   :  { %v854_v59 = vrot.slane %v802_v3, %v2873_v30 }
 0x1e8   :  { %v811_v13 = vpop.permute.xlu0 %810 }
 0x1e9   :  { %v912_v55 = vsel %vm911_vm2, %v854_v59, %v850_v51  ;;  %v866_v39 = vrot.slane %v811_v13, %v2873_v30 }
 0x1ea   :  { %v805_v46 = vpop.permute.xlu1 %804 }
 0x1eb   :  { %v858_v37 = vrot.slane %v805_v46, %v2873_v30 }
 0x1ec   :  { %v808_v19 = vpop.permute.xlu0 %807 }
 0x1ed   :  { %v862_v58 = vrot.slane %v808_v19, %v2873_v30  ;;  %v914_v0 = vsel %vm913_vm3, %v858_v37, %v912_v55 }
 0x1ee   :  { %v826_v21 = vpop.permute.xlu1 %825 }
 0x1ef   :  { %v916_v1 = vsel %vm915_vm4, %v862_v58, %v914_v0  ;;  %v886_v42 = vrot.slane %v826_v21, %v2873_v30 }
 0x1f0   :  { %v814_v31 = vpop.permute.xlu0 %813  ;;  %v918_v21 = vsel %vm917_vm5, %v866_v39, %v916_v1 }
 0x1f1   :  { %v870_v44 = vrot.slane %v814_v31, %v2873_v30 }
 0x1f2   :  { %v832_v35 = vpop.permute.xlu1 %831 }
 0x1f3   :  { %v894_v24 = vrot.slane %v832_v35, %v2873_v30  ;;  %v920_v13 = vsel %vm919_vm6, %v870_v44, %v918_v21 }
 0x1f4   :  { %v817_v52 = vpop.permute.xlu0 %816 }
 0x1f5   :  { %v874_v3 = vrot.slane %v817_v52, %v2873_v30 }
 0x1f6   :  { %v829_v36 = vpop.permute.xlu1 %828 }
 0x1f7   :  { %v890_v46 = vrot.slane %v829_v36, %v2873_v30  ;;  %v922_v0 = vsel %vm921_vm7, %v874_v3, %v920_v13 }
 0x1fa   :  { %v838_v61 = vpop.permute.xlu1 %837 }
 0x1fb   :  { %v902_v52 = vrot.slane %v838_v61, %v2873_v30 }
 0x1fc   :  { %v823_v5 = vpop.permute.xlu0 %822 }
 0x1fd   :  { %v882_v6 = vrot.slane %v823_v5, %v2873_v30 }
 0x1fe   :  { %v835_v19 = vpop.permute.xlu1 %834 }
 0x1ff   :  { %v925_v59 = vsel %vm911_vm2, %v886_v42, %v882_v6  ;;  %v898_v37 = vrot.slane %v835_v19, %v2873_v30 }
 0x200   :  { %v926_v31 = vsel %vm913_vm3, %v890_v46, %v925_v59  ;;  %v820_v51 = vpop.permute.xlu0 %819 }
 0x201   :  { %v927_v36 = vsel %vm915_vm4, %v894_v24, %v926_v31  ;;  %v878_v35 = vrot.slane %v820_v51, %v2873_v30 }
 0x202   :  { %v928_v55 = vsel %vm917_vm5, %v898_v37, %v927_v36  ;;  %v841_v58 = vpop.permute.xlu1 %840 }
 0x203   :  { %v906_v5 = vrot.slane %v841_v58, %v2873_v30  ;;  %v924_v1 = vsel %vm923_vm8, %v878_v35, %v922_v0  ;;  %v929_v42 = vsel %vm919_vm6, %v902_v52, %v928_v55 }
 0x204   :  { %v844_v6 = vpop.permute.xlu0 %843  ;;  %v935_v44 = vsel %vm934_vm9, %v924_v1, -inf }
 0x205   :  { %v910_v61 = vrot.slane %v844_v6, %v2873_v30  ;;  %936 = vmax.xlane.f32.xlu1 %v935_v44  ;;  %v930_v39 = vsel %vm921_vm7, %v906_v5, %v929_v42 }
 0x207   :  { %v931_v46 = vsel %vm923_vm8, %v910_v61, %v930_v39 }
 0x208   :  { %v938_v19 = vsel %vm934_vm9, %v931_v46, -inf }
 0x209   :  { %939 = vmax.xlane.f32.xlu0 %v938_v19 }
 0x28e   :  { %v937_v3 = vpop.xlane.xlu1 %936 }
 0x28f   :  { %v946_v24 = vrot.slane %v937_v3, %v2572_v15  ;;  %v950_v59 = vrot.slane %v937_v3, %v2560_v11  ;;  %v954_v37 = vrot.slane %v937_v3, %v2575_v16  ;;  %v958_v21 = vrot.slane %v937_v3, %v2617_v28 }
 0x290   :  { %v962_v31 = vrot.slane %v937_v3, %v2632_v33  ;;  %v966_v5 = vrot.slane %v937_v3, %v2647_v38 }
 0x291   :  { %v1023_v51 = vsub.f32 %v2823_v23, %v946_v24  ;;  %v1024_v13 = vsub.f32 %v2826_v56, %v950_v59  ;;  %v1026_v52 = vsub.f32 %v2834_v7, %v958_v21  ;;  %v1025_v36 = vsub.f32 %v2831_v63, %v954_v37 }
 0x292   :  { %v940_v35 = vpop.xlane.xlu0 %939  ;;  %v1027_v1 = vsub.f32 %v2828_v62, %v962_v31  ;;  %v970_v7 = vrot.slane %v937_v3, %v2662_v43  ;;  %v1028_v63 = vsub.f32 %v2840_v20, %v966_v5  ;;  %v974_v37 = vrot.slane %v937_v3, %v2677_v48 }
 0x293   :  { %v1039_v55 = vmul.f32 1.442695, %v1023_v51  ;;  %v1041_v58 = vmul.f32 1.442695, %v1024_v13  ;;  %v982_v0 = vrot.slane %v940_v35, %v2560_v11  ;;  %v1045_v42 = vmul.f32 1.442695, %v1026_v52 }
 0x294   :  { %v1043_v6 = vmul.f32 1.442695, %v1025_v36  ;;  %v986_v23 = vrot.slane %v940_v35, %v2575_v16  ;;  %v1047_v44 = vmul.f32 1.442695, %v1027_v1  ;;  %v990_v61 = vrot.slane %v940_v35, %v2617_v28 }
 0x295   :  { %2425 = vpow2.f32 %v1039_v55  ;;  %v1032_v56 = vsub.f32 %v2837_v12, %v982_v0  ;;  %v1029_v46 = vsub.f32 %v2846_v29, %v970_v7  ;;  %v1049_v19 = vmul.f32 1.442695, %v1028_v63 }
 0x296   :  { %2427 = vpow2.f32 %v1041_v58  ;;  %v1033_v39 = vsub.f32 %v2849_v47, %v986_v23  ;;  %v978_v24 = vrot.slane %v940_v35, %v2572_v15  ;;  %v994_v12 = vrot.slane %v940_v35, %v2632_v33 }
 0x297   :  { %2429 = vpow2.f32 %v1045_v42  ;;  %v1057_v62 = vmul.f32 1.442695, %v1032_v56  ;;  %v1034_v59 = vsub.f32 %v2843_v22, %v990_v61  ;;  %v1051_v21 = vmul.f32 1.442695, %v1029_v46 }
 0x298   :  { %2431 = vpow2.f32 %v1043_v6  ;;  %v1059_v20 = vmul.f32 1.442695, %v1033_v39  ;;  %v1031_v31 = vsub.f32 %v2855_v40, %v978_v24  ;;  %v998_v29 = vrot.slane %v940_v35, %v2647_v38 }
 0x299   :  { %2433 = vpow2.f32 %v1047_v44  ;;  %v1035_v51 = vsub.f32 %v2858_v32, %v994_v12  ;;  %v1061_v13 = vmul.f32 1.442695, %v1034_v59  ;;  %v1030_v22 = vsub.f32 %v2861_v4, %v974_v37 }
 0x29a   :  { %2435 = vpow2.f32 %v1057_v62  ;;  %v1006_v3 = vrot.slane %v940_v35, %v2677_v48  ;;  %v1055_v40 = vmul.f32 1.442695, %v1031_v31  ;;  %v1002_v55 = vrot.slane %v940_v35, %v2662_v43 }
 0x29b   :  { %2437 = vpow2.f32 %v1049_v19  ;;  %v1036_v32 = vsub.f32 %v2853_v41, %v998_v29  ;;  %v1063_v58 = vmul.f32 1.442695, %v1035_v51  ;;  %v1053_v5 = vmul.f32 1.442695, %v1030_v22 }
 0x29c   :  { %2439 = vpow2.f32 %v1059_v20  ;;  %v1038_v4 = vsub.f32 %v2867_v17, %v1006_v3  ;;  %v1037_v42 = vsub.f32 %v2864_v8, %v1002_v55 }
 0x29d   :  { %2441 = vpow2.f32 %v1051_v21  ;;  %v1065_v35 = vmul.f32 1.442695, %v1036_v32 }
 0x29e   :  { %2443 = vpow2.f32 %v1061_v13  ;;  %v1069_v41 = vmul.f32 1.442695, %v1038_v4  ;;  %v1067_v56 = vmul.f32 1.442695, %v1037_v42 }
 0x29f   :  { %2445 = vpow2.f32 %v1055_v40 }
 0x2a0   :  { %2447 = vpow2.f32 %v1063_v58 }
 0x2a1   :  { %2449 = vpow2.f32 %v1053_v5 }
 0x2a2   :  { %v2931_v47 = vpop.eup %2425  ;;  %2451 = vpow2.f32 %v1065_v35 }
 0x2a3   :  { %v2935_v52 = vpop.eup %2427  ;;  %1088 = vperm.xlu0 %2423, %v2931_v47   ;;  %2453 = vpow2.f32 %v1069_v41 }
 0x2a4   :  { %1091 = vperm.xlu1 %2424, %v2935_v52   ;;  %v2941_v36 = vpop.eup %2429  ;;  %2455 = vpow2.f32 %v1067_v56 }
 0x2a5   :  { %v2945_v0 = vpop.eup %2431 }
 0x2a6   :  { %v2950_v1 = vpop.eup %2433 }
 0x2a7   :  { %1097 = vperm.xlu0 %2423, %v2941_v36   ;;  %v2953_v6 = vpop.eup %2435 }
 0x2a8   :  { %1094 = vperm.xlu1 %2424, %v2945_v0   ;;  %v2957_v23 = vpop.eup %2437 }
 0x2a9   :  { %v2959_v17 = vpop.eup %2439 }
 0x2aa   :  { %v2963_v8 = vpop.eup %2441 }
 0x2ab   :  { %1100 = vperm.xlu0 %2423, %v2950_v1   ;;  %v2965_v7 = vpop.eup %2443 }
 0x2ac   :  { %1115 = vperm.xlu1 %2424, %v2953_v6   ;;  %v2969_v63 = vpop.eup %2445 }
 0x2ad   :  { %v2971_v44 = vpop.eup %2447 }
 0x2ae   :  { %v2975_v61 = vpop.eup %2449 }
 0x2af   :  { %1103 = vperm.xlu0 %2423, %v2957_v23   ;;  %v2977_v39 = vpop.eup %2451 }
 0x2b0   :  { %1118 = vperm.xlu1 %2424, %v2959_v17   ;;  %v2981_v62 = vpop.eup %2453 }
 0x2b1   :  { %v2983_v46 = vpop.eup %2455 }
 0x2b3   :  { %1106 = vperm.xlu0 %2423, %v2963_v8  }
 0x2b4   :  { %1121 = vperm.xlu1 %2424, %v2965_v7  }
 0x2b7   :  { %1112 = vperm.xlu0 %2423, %v2969_v63  }
 0x2b8   :  { %1124 = vperm.xlu1 %2424, %v2971_v44  }
 0x2bb   :  { %1109 = vperm.xlu0 %2423, %v2975_v61  }
 0x2bc   :  { %1127 = vperm.xlu1 %2424, %v2977_v39  }
 0x2bf   :  { %1133 = vperm.xlu0 %2423, %v2981_v62  }
 0x2c0   :  { %1130 = vperm.xlu1 %2424, %v2983_v46  }
 0x31e   :  { %v1089_v19 = vpop.permute.xlu0 %1088 }
 0x31f   :  { %v1092_v24 = vpop.permute.xlu1 %1091  ;;  %v1138_v51 = vrot.slane %v1089_v19, %v2873_v30 }
 0x320   :  { %v1142_v29 = vrot.slane %v1092_v24, %v2873_v30 }
 0x322   :  { %v1098_v12 = vpop.permute.xlu0 %1097  ;;  %v1199_v40 = vsel %vm911_vm2, %v1142_v29, %v1138_v51 }
 0x323   :  { %v1095_v59 = vpop.permute.xlu1 %1094  ;;  %v1150_v55 = vrot.slane %v1098_v12, %v2873_v30 }
 0x324   :  { %v1146_v13 = vrot.slane %v1095_v59, %v2873_v30 }
 0x326   :  { %v1101_v20 = vpop.permute.xlu0 %1100  ;;  %v1200_v32 = vsel %vm913_vm3, %v1146_v13, %v1199_v40 }
 0x327   :  { %v1116_v37 = vpop.permute.xlu1 %1115  ;;  %v1154_v58 = vrot.slane %v1101_v20, %v2873_v30  ;;  %v1201_v24 = vsel %vm915_vm4, %v1150_v55, %v1200_v32 }
 0x328   :  { %v1174_v4 = vrot.slane %v1116_v37, %v2873_v30 }
 0x329   :  { %v1202_v20 = vsel %vm917_vm5, %v1154_v58, %v1201_v24 }
 0x32a   :  { %v1104_v21 = vpop.permute.xlu0 %1103 }
 0x32b   :  { %v1119_v31 = vpop.permute.xlu1 %1118  ;;  %v1158_v42 = vrot.slane %v1104_v21, %v2873_v30 }
 0x32c   :  { %v1178_v56 = vrot.slane %v1119_v31, %v2873_v30 }
 0x32d   :  { %v1203_v21 = vsel %vm919_vm6, %v1158_v42, %v1202_v20 }
 0x32e   :  { %v1107_v22 = vpop.permute.xlu0 %1106 }
 0x32f   :  { %v1122_v3 = vpop.permute.xlu1 %1121  ;;  %v1162_v19 = vrot.slane %v1107_v22, %v2873_v30 }
 0x330   :  { %v1182_v12 = vrot.slane %v1122_v3, %v2873_v30 }
 0x331   :  { %v1204_v40 = vsel %vm921_vm7, %v1162_v19, %v1203_v21 }
 0x332   :  { %v1113_v5 = vpop.permute.xlu0 %1112 }
 0x333   :  { %v1125_v35 = vpop.permute.xlu1 %1124  ;;  %v1170_v41 = vrot.slane %v1113_v5, %v2873_v30 }
 0x334   :  { %v1186_v22 = vrot.slane %v1125_v35, %v2873_v30 }
 0x335   :  { %v1206_v59 = vsel %vm911_vm2, %v1174_v4, %v1170_v41 }
 0x336   :  { %v1207_v29 = vsel %vm913_vm3, %v1178_v56, %v1206_v59  ;;  %v1110_v37 = vpop.permute.xlu0 %1109 }
 0x337   :  { %v1128_v51 = vpop.permute.xlu1 %1127  ;;  %v1208_v13 = vsel %vm915_vm4, %v1182_v12, %v1207_v29  ;;  %v1166_v31 = vrot.slane %v1110_v37, %v2873_v30 }
 0x338   :  { %v1190_v3 = vrot.slane %v1128_v51, %v2873_v30  ;;  %v1209_v32 = vsel %vm917_vm5, %v1186_v22, %v1208_v13 }
 0x339   :  { %v1205_v55 = vsel %vm923_vm8, %v1166_v31, %v1204_v40 }
 0x33a   :  { %v1134_v58 = vpop.permute.xlu0 %1133  ;;  %v1215_v5 = vsel %vm934_vm9, %v1205_v55, 0.0  ;;  %v1210_v56 = vsel %vm919_vm6, %v1190_v3, %v1209_v32 }
 0x33b   :  { %v1131_v4 = vpop.permute.xlu1 %1130  ;;  %v1198_v42 = vrot.slane %v1134_v58, %v2873_v30  ;;  %1216 = vadd.xlane.f32.xlu1 %v1215_v5 }
 0x33c   :  { %v1194_v41 = vrot.slane %v1131_v4, %v2873_v30 }
 0x33e   :  { %v1211_v35 = vsel %vm921_vm7, %v1194_v41, %v1210_v56  ;;  %v52_v41 = vld [vmem:[%s3256_s3 + $0x40] sm:$0xff] }
 0x33f   :  { %v1212_v19 = vsel %vm923_vm8, %v1198_v42, %v1211_v35 }
 0x340   :  { %v1218_v24 = vsel %vm934_vm9, %v1212_v19, 0.0 }
 0x341   :  { %1219 = vadd.xlane.f32.xlu0 %v1218_v24 }
 0x3c4   :  { %v1217_v12 = vpop.xlane.xlu1 %1216 }
 0x3c5   :  { %2457 = vrcp.f32 %v1217_v12 }
 0x3ca   :  { %v1220_v59 = vpop.xlane.xlu0 %1219 }
 0x3cb   :  { %2459 = vrcp.f32 %v1220_v59 }
 0x3d2   :  { %v2458_v20 = vpop.eup %2457 }
 0x3d3   :  { %v1232_v29 = vrot.slane %v2458_v20, %v2560_v11  ;;  %v1228_v37 = vrot.slane %v2458_v20, %v2572_v15  ;;  %v1236_v51 = vrot.slane %v2458_v20, %v2575_v16  ;;  %v1240_v13 = vrot.slane %v2458_v20, %v2617_v28 }
 0x3d4   :  { %v1244_v3 = vrot.slane %v2458_v20, %v2632_v33  ;;  %v1248_v32 = vrot.slane %v2458_v20, %v2647_v38  ;;  %v1252_v5 = vrot.slane %v2458_v20, %v2662_v43 }
 0x3d5   :  { %v1306_v30 = vmul.f32 %v2935_v52, %v1232_v29  ;;  %v1305_v21 = vmul.f32 %v2931_v47, %v1228_v37  ;;  %v1307_v22 = vmul.f32 %v2945_v0, %v1236_v51  ;;  %v1308_v40 = vmul.f32 %v2941_v36, %v1240_v13 }
 0x3d6   :  { %v1309_v52 = vmul.f32 %v2950_v1, %v1244_v3  ;;  %v1310_v0 = vmul.f32 %v2957_v23, %v1248_v32  ;;  %v1311_v1 = vmul.f32 %v2963_v8, %v1252_v5 }
 0x3d7   :  { %1328 = vperm.xlu1 %2424, %v1306_v30   ;;  %1323 = vperm.xlu0 %2423, %v1305_v21  }
 0x3d8   :  { %v2460_v31 = vpop.eup %2459 }
 0x3d9   :  { %v1264_v55 = vrot.slane %v2460_v31, %v2560_v11  ;;  %v1268_v58 = vrot.slane %v2460_v31, %v2575_v16  ;;  %v1272_v11 = vrot.slane %v2460_v31, %v2617_v28  ;;  %v1276_v4 = vrot.slane %v2460_v31, %v2632_v33 }
 0x3da   :  { %v1260_v16 = vrot.slane %v2460_v31, %v2572_v15  ;;  %v1280_v42 = vrot.slane %v2460_v31, %v2647_v38  ;;  %v1256_v28 = vrot.slane %v2458_v20, %v2677_v48  ;;  %v1284_v33 = vrot.slane %v2460_v31, %v2662_v43  ;;  %v59_v38 = vld [vmem:[%s3256_s3 + $0x78] sm:$0xff]  ;;  %v58_v43 = vld [vmem:[%s3256_s3 + $0x70] sm:$0xff] }
 0x3db   :  { %1333 = vperm.xlu1 %2424, %v1307_v22   ;;  %1338 = vperm.xlu0 %2423, %v1308_v40   ;;  %v1314_v47 = vmul.f32 %v2953_v6, %v1264_v55  ;;  %v1315_v36 = vmul.f32 %v2959_v17, %v1268_v58  ;;  %v1316_v6 = vmul.f32 %v2965_v7, %v1272_v11 }
 0x3dc   :  { %v1317_v23 = vmul.f32 %v2971_v44, %v1276_v4  ;;  %v1313_v17 = vmul.f32 %v2969_v63, %v1260_v16  ;;  %v1318_v8 = vmul.f32 %v2977_v39, %v1280_v42  ;;  %v1312_v7 = vmul.f32 %v2975_v61, %v1256_v28  ;;  %2349 = vmatprep.subr.mxu0 %v59_v38  ;;  %v56_v61 = vld [vmem:[%s3256_s3 + $0x60] sm:$0xff]  ;;  %v55_v39 = vld [vmem:[%s3256_s3 + $0x58] sm:$0xff] }
 0x3dd   :  { %v1288_v15 = vrot.slane %v2460_v31, %v2677_v48  ;;  %v1319_v44 = vmul.f32 %v2983_v46, %v1284_v33  ;;  %2350 = vmatpush3.msra.mxu0 %v59_v38  ;;  %v57_v48 = vld [vmem:[%s3256_s3 + $0x68] sm:$0xff] }
 0x3de   :  { %2351 = vmatprep.subr.mxu0 %v58_v43  ;;  %v53_v46 = vld [vmem:[%s3256_s3 + $0x48] sm:$0xff] }
 0x3df   :  { %1343 = vperm.xlu0 %2423, %v1309_v52   ;;  %1368 = vperm.xlu1 %2424, %v1314_v47   ;;  %v1320_v63 = vmul.f32 %v2981_v62, %v1288_v15  ;;  %v54_v62 = vld [vmem:[%s3256_s3 + $0x50] sm:$0xff] }
 0x3e0   :  { %2352 = vmatpush3.msra.mxu0 %v58_v43 }
 0x3e1   :  { %2353 = vmatprep.subr.mxu0 %v57_v48 }
 0x3e2   :  { %2354 = vmatpush3.msra.mxu0 %v57_v48 }
 0x3e3   :  { %1348 = vperm.xlu0 %2423, %v1310_v0   ;;  %1373 = vperm.xlu1 %2424, %v1315_v36  }
 0x3e4   :  { %2355 = vmatprep.subr.mxu0 %v56_v61 }
 0x3e5   :  { %2356 = vmatpush3.msra.mxu0 %v56_v61 }
 0x3e6   :  { %2357 = vmatprep.subr.mxu0 %v55_v39 }
 0x3e7   :  { %1353 = vperm.xlu0 %2423, %v1311_v1   ;;  %1378 = vperm.xlu1 %2424, %v1316_v6  }
 0x3e8   :  { %2358 = vmatpush3.msra.mxu0 %v55_v39 }
 0x3e9   :  { %2359 = vmatprep.subr.mxu0 %v54_v62 }
 0x3ea   :  { %2360 = vmatpush3.msra.mxu0 %v54_v62 }
 0x3eb   :  { %1383 = vperm.xlu1 %2424, %v1317_v23   ;;  %1363 = vperm.xlu0 %2423, %v1313_v17  }
 0x3ec   :  { %2361 = vmatprep.subr.mxu0 %v53_v46 }
 0x3ed   :  { %2362 = vmatpush3.msra.mxu0 %v53_v46 }
 0x3ee   :  { %2363 = vmatprep.subr.mxu0 %v52_v41 }
 0x3ef   :  { %1388 = vperm.xlu1 %2424, %v1318_v8   ;;  %1358 = vperm.xlu0 %2423, %v1312_v7  }
 0x3f0   :  { %2364 = vmatpush3.msra.mxu0 %v52_v41 }
 0x3f3   :  { %1393 = vperm.xlu1 %2424, %v1319_v44   ;;  %1398 = vperm.xlu0 %2423, %v1320_v63  }
 0x452   :  { %v1329_v56 = vpop.permute.xlu1 %1328  ;;  %v1324_v35 = vpop.permute.xlu0 %1323 }
 0x453   :  { %v1402_v19 = vmul.f32 %v1329_v56, %v2706_v14  ;;  %v1401_v24 = vmul.f32 %v1324_v35, %v2712_v18 }
 0x455   :  { %v1424_v12 = vsel %vm568_vm1, %v1402_v19, 0.0  ;;  %v1417_v59 = vsel %vm568_vm1, %v1401_v24, 0.0 }
 0x456   :  { %v1425_v20 = vrot.slane %v1424_v12, 4  ;;  %v1418_v29 = vrot.slane %v1417_v59, 4  ;;  %v1334_v37 = vpop.permute.xlu1 %1333  ;;  %v1339_v30 = vpop.permute.xlu0 %1338 }
 0x457   :  { %v1403_v21 = vmul.f32 %v1334_v37, %v2717_v25  ;;  %v1404_v51 = vmul.f32 %v1339_v30, %v2744_v53 }
 0x458   :  { %v1426_v13 = vadd.f32 %v1425_v20, %v1424_v12  ;;  %v1419_v31 = vadd.f32 %v1418_v29, %v1417_v59 }
 0x459   :  { %v1431_v22 = vsel %vm568_vm1, %v1403_v21, 0.0  ;;  %v1438_v14 = vsel %vm568_vm1, %v1404_v51, 0.0 }
 0x45a   :  { %v1427_v40 = vrot.slane %v1426_v13, 2  ;;  %v1420_v18 = vrot.slane %v1419_v31, 2  ;;  %v1432_v3 = vrot.slane %v1431_v22, 4  ;;  %v1439_v55 = vrot.slane %v1438_v14, 4  ;;  %v1369_v52 = vpop.permute.xlu1 %1368  ;;  %v1344_v47 = vpop.permute.xlu0 %1343 }
 0x45b   :  { %v1410_v32 = vmul.f32 %v1369_v52, %v2740_v50  ;;  %v1405_v58 = vmul.f32 %v1344_v47, %v2720_v26 }
 0x45c   :  { %v1428_v0 = vadd.f32 %v1427_v40, %v1426_v13  ;;  %v1421_v25 = vadd.f32 %v1420_v18, %v1419_v31  ;;  %v1433_v36 = vadd.f32 %v1432_v3, %v1431_v22  ;;  %v1440_v53 = vadd.f32 %v1439_v55, %v1438_v14 }
 0x45d   :  { %v1480_v5 = vsel %vm568_vm1, %v1410_v32, 0.0  ;;  %v1445_v11 = vsel %vm568_vm1, %v1405_v58, 0.0 }
 0x45e   :  { %v1429_v1 = vrot.slane %v1428_v0, 1  ;;  %v1422_v6 = vrot.slane %v1421_v25, 1  ;;  %v1434_v4 = vrot.slane %v1433_v36, 2  ;;  %v1441_v16 = vrot.slane %v1440_v53, 2  ;;  %v1374_v23 = vpop.permute.xlu1 %1373  ;;  %v1349_v17 = vpop.permute.xlu0 %1348 }
 0x45f   :  { %v1481_v42 = vrot.slane %v1480_v5, 4  ;;  %v1446_v28 = vrot.slane %v1445_v11, 4  ;;  %v1411_v50 = vmul.f32 %v1374_v23, %v2767_v10  ;;  %v1406_v26 = vmul.f32 %v1349_v17, %v2751_v60 }
 0x460   :  { %v1435_v8 = vadd.f32 %v1434_v4, %v1433_v36  ;;  %v1442_v7 = vadd.f32 %v1441_v16, %v1440_v53  ;;  %v1430_v33 = vadd.f32 %v1429_v1, %v1428_v0  ;;  %v1423_v38 = vadd.f32 %v1422_v6, %v1421_v25 }
 0x461   :  { %v1482_v15 = vadd.f32 %v1481_v42, %v1480_v5  ;;  %v1487_v44 = vsel %vm568_vm1, %v1411_v50, 0.0  ;;  %v1452_v63 = vsel %vm568_vm1, %v1406_v26, 0.0  ;;  %v1447_v48 = vadd.f32 %v1446_v28, %v1445_v11 }
 0x462   :  { %v1436_v43 = vrot.slane %v1435_v8, 1  ;;  %v1488_v61 = vrot.slane %v1487_v44, 4  ;;  %v1379_v39 = vpop.permute.xlu1 %1378  ;;  %v1354_v62 = vpop.permute.xlu0 %1353  ;;  %v1443_v46 = vrot.slane %v1442_v7, 1  ;;  %v1453_v56 = vrot.slane %v1452_v63, 4 }
 0x463   :  { %v1483_v41 = vrot.slane %v1482_v15, 2  ;;  %v1412_v10 = vmul.f32 %v1379_v39, %v2757_v2  ;;  %v1407_v19 = vmul.f32 %v1354_v62, %v2764_v9  ;;  %v1549_v59 = vsel %vm911_vm2, %v1430_v33, %v1423_v38 }
 0x464   :  { %v1437_v60 = vadd.f32 %v1436_v43, %v1435_v8  ;;  %v1489_v35 = vadd.f32 %v1488_v61, %v1487_v44  ;;  %v1454_v24 = vadd.f32 %v1453_v56, %v1452_v63  ;;  %v1448_v20 = vrot.slane %v1447_v48, 2 }
 0x465   :  { %v1494_v12 = vsel %vm568_vm1, %v1412_v10, 0.0  ;;  %v1459_v37 = vsel %vm568_vm1, %v1407_v19, 0.0  ;;  %v1444_v13 = vadd.f32 %v1443_v46, %v1442_v7  ;;  %v1484_v31 = vadd.f32 %v1483_v41, %v1482_v15 }
 0x466   :  { %v1495_v29 = vrot.slane %v1494_v12, 4  ;;  %v1384_v30 = vpop.permute.xlu1 %1383  ;;  %v1364_v21 = vpop.permute.xlu0 %1363  ;;  %v1550_v51 = vsel %vm913_vm3, %v1437_v60, %v1549_v59  ;;  %v1490_v2 = vrot.slane %v1489_v35, 2  ;;  %v1460_v14 = vrot.slane %v1459_v37, 4 }
 0x467   :  { %v1413_v9 = vmul.f32 %v1384_v30, %v2789_v45  ;;  %v1455_v40 = vrot.slane %v1454_v24, 2  ;;  %v1409_v18 = vmul.f32 %v1364_v21, %v2795_v49  ;;  %v1449_v3 = vadd.f32 %v1448_v20, %v1447_v48 }
 0x468   :  { %v1496_v22 = vadd.f32 %v1495_v29, %v1494_v12  ;;  %v1461_v52 = vadd.f32 %v1460_v14, %v1459_v37  ;;  %v3101_v0 = vsel %vm915_vm4, %v1444_v13, %v1550_v51  ;;  %v1485_v5 = vrot.slane %v1484_v31, 1 }
 0x469   :  { %v1501_v47 = vsel %vm568_vm1, %v1413_v9, 0.0  ;;  %v1473_v36 = vsel %vm568_vm1, %v1409_v18, 0.0  ;;  %v1491_v45 = vadd.f32 %v1490_v2, %v1489_v35  ;;  %v1456_v49 = vadd.f32 %v1455_v40, %v1454_v24 }
 0x46a   :  { %v1497_v55 = vrot.slane %v1496_v22, 2  ;;  %v1389_v32 = vpop.permute.xlu1 %1388  ;;  %v1359_v58 = vpop.permute.xlu0 %1358  ;;  %v1502_v25 = vrot.slane %v1501_v47, 4  ;;  %v1462_v11 = vrot.slane %v1461_v52, 2  ;;  %v1474_v1 = vrot.slane %v1473_v36, 4 }
 0x46b   :  { %v1414_v53 = vmul.f32 %v1389_v32, %v2776_v27  ;;  %v1408_v16 = vmul.f32 %v1359_v58, %v2781_v34  ;;  %v1450_v15 = vrot.slane %v1449_v3, 1  ;;  %v1492_v44 = vrot.slane %v1491_v45, 1 }
 0x46c   :  { %v1503_v6 = vadd.f32 %v1502_v25, %v1501_v47  ;;  %v1498_v23 = vadd.f32 %v1497_v55, %v1496_v22  ;;  %v1463_v17 = vadd.f32 %v1462_v11, %v1461_v52  ;;  %v1475_v42 = vadd.f32 %v1474_v1, %v1473_v36 }
 0x46d   :  { %v1508_v4 = vsel %vm568_vm1, %v1414_v53, 0.0  ;;  %v1466_v7 = vsel %vm568_vm1, %v1408_v16, 0.0  ;;  %v1457_v39 = vrot.slane %v1456_v49, 1  ;;  %v1486_v12 = vadd.f32 %v1485_v5, %v1484_v31 }
 0x46e   :  { %v1509_v28 = vrot.slane %v1508_v4, 4  ;;  %v1394_v50 = vpop.permute.xlu1 %1393  ;;  %v1399_v26 = vpop.permute.xlu0 %1398  ;;  %v1504_v8 = vrot.slane %v1503_v6, 2  ;;  %v1476_v63 = vrot.slane %v1475_v42, 2  ;;  %v1467_v48 = vrot.slane %v1466_v7, 4 }
 0x46f   :  { %v1415_v27 = vmul.f32 %v1394_v50, %v2802_v57  ;;  %v1416_v33 = vmul.f32 %v1399_v26, %v2807_v54  ;;  %v1499_v56 = vrot.slane %v1498_v23, 1  ;;  %v1464_v10 = vrot.slane %v1463_v17, 1  ;;  %v2483_v26 = vld [vmem:[%s3257_s1 + $0x8] sm:$0xff] }
 0x470   :  { %v1510_v38 = vadd.f32 %v1509_v28, %v1508_v4  ;;  %v1505_v43 = vadd.f32 %v1504_v8, %v1503_v6  ;;  %v1477_v62 = vadd.f32 %v1476_v63, %v1475_v42  ;;  %v1468_v60 = vadd.f32 %v1467_v48, %v1466_v7 }
 0x471   :  { %v1515_v34 = vsel %vm568_vm1, %v1415_v27, 0.0  ;;  %v1522_v61 = vsel %vm568_vm1, %v1416_v33, 0.0  ;;  %v1451_v59 = vadd.f32 %v1450_v15, %v1449_v3  ;;  %v1493_v37 = vadd.f32 %v1492_v44, %v1491_v45  ;;  %v2484_v27 = vld [vmem:[%s3257_s1] sm:$0xff] }
 0x472   :  { %v1511_v46 = vrot.slane %v1510_v38, 2  ;;  %v1516_v41 = vrot.slane %v1515_v34, 4  ;;  %v1523_v57 = vrot.slane %v1522_v61, 4  ;;  %v1506_v35 = vrot.slane %v1505_v43, 1 }
 0x473   :  { %v1478_v54 = vrot.slane %v1477_v62, 1  ;;  %v1469_v20 = vrot.slane %v1468_v60, 2  ;;  %v1458_v13 = vadd.f32 %v1457_v39, %v1456_v49  ;;  %v1500_v2 = vadd.f32 %v1499_v56, %v1498_v23  ;;  %v2226_v23 = vld [vmem:[%s3260_s4 + $0x2] ss:$0 sm:$0xff]  ;;  %v62_v56 = vld [vmem:[%s3256_s3 + $0x90] sm:$0xff] }
 0x474   :  { %v1512_v19 = vadd.f32 %v1511_v46, %v1510_v38  ;;  %v1517_v24 = vadd.f32 %v1516_v41, %v1515_v34  ;;  %v1524_v29 = vadd.f32 %v1523_v57, %v1522_v61  ;;  %v1465_v9 = vadd.f32 %v1464_v10, %v1463_v17  ;;  %v63_v41 = vld [vmem:[%s3256_s3 + $0x98] sm:$0xff]  ;;  %v61_v10 = vld [vmem:[%s3256_s3 + $0x88] sm:$0xff] }
 0x475   :  { %v1479_v30 = vadd.f32 %v1478_v54, %v1477_v62  ;;  %v1470_v22 = vadd.f32 %v1469_v20, %v1468_v60  ;;  %v1507_v40 = vadd.f32 %v1506_v35, %v1505_v43  ;;  %v1552_v58 = vsel %vm917_vm5, %v1451_v59, %v3101_v0  ;;  %2368 = vmatprep.subr.mxu0 %v63_v41  ;;  %v60_v60 = vld [vmem:[%s3256_s3 + $0x80] sm:$0xff] }
 0x476   :  { %v1513_v21 = vrot.slane %v1512_v19, 1  ;;  %v1518_v51 = vrot.slane %v1517_v24, 2  ;;  %v1525_v14 = vrot.slane %v1524_v29, 2  ;;  %v1553_v5 = vsel %vm919_vm6, %v1458_v13, %v1552_v58  ;;  %v2229_v20 = vld [vmem:[%s3260_s4 + $0x3] ss:$0 sm:$0xff] }
 0x477   :  { %v1556_v18 = vsel %vm911_vm2, %v1486_v12, %v1479_v30  ;;  %v1471_v31 = vrot.slane %v1470_v22, 1  ;;  %v1554_v1 = vsel %vm921_vm7, %v1465_v9, %v1553_v5  ;;  %v70_v9 = vld [vmem:[%s3256_s3 + $0xd0] sm:$0xff] }
 0x478   :  { %v1519_v55 = vadd.f32 %v1518_v51, %v1517_v24  ;;  %v1557_v52 = vsel %vm913_vm3, %v1493_v37, %v1556_v18  ;;  %v1514_v47 = vadd.f32 %v1513_v21, %v1512_v19  ;;  %v1526_v3 = vadd.f32 %v1525_v14, %v1524_v29  ;;  %v2230_v37 = vld [vmem:[%s3260_s4 + $0x4] ss:$0 sm:$0xff]  ;;  %v71_v14 = vld [vmem:[%s3256_s3 + $0xd8] sm:$0xff] }
 0x479   :  { %v1558_v25 = vsel %vm915_vm4, %v1500_v2, %v1557_v52  ;;  %v1472_v36 = vadd.f32 %v1471_v31, %v1470_v22  ;;  %2379 = vmatprep.subr.mxu1 %v71_v14  ;;  %v68_v18 = vld [vmem:[%s3256_s3 + $0xc0] sm:$0xff]  ;;  %v66_v52 = vld [vmem:[%s3256_s3 + $0xb0] sm:$0xff] }
 0x47a   :  { %v1520_v32 = vrot.slane %v1519_v55, 1  ;;  %v1527_v53 = vrot.slane %v1526_v3, 1  ;;  %v1559_v45 = vsel %vm917_vm5, %v1507_v40, %v1558_v25  ;;  %2380 = vmatpush3.msra.mxu1 %v71_v14  ;;  %v69_v40 = vld [vmem:[%s3256_s3 + $0xc8] sm:$0xff]  ;;  %v64_v31 = vld [vmem:[%s3256_s3 + $0xa0] sm:$0xff] }
 0x47b   :  { %v1555_v6 = vsel %vm923_vm8, %v1472_v36, %v1554_v1  ;;  %v1560_v4 = vsel %vm919_vm6, %v1514_v47, %v1559_v45  ;;  %2381 = vmatprep.subr.mxu1 %v70_v9  ;;  %v65_v47 = vld [vmem:[%s3256_s3 + $0xa8] sm:$0xff] }
 0x47c   :  { %v1521_v11 = vadd.f32 %v1520_v32, %v1519_v55  ;;  %v1528_v49 = vadd.f32 %v1527_v53, %v1526_v3  ;;  %2365 = vmatprep.mubr.msk.f32.mxu0 %vm568_vm1, %v1555_v6  ;;  %2382 = vmatpush3.msra.mxu1 %v70_v9  ;;  %v67_v55 = vld [vmem:[%s3256_s3 + $0xb8] sm:$0xff]  ;;  %v2231_v3 = vld [vmem:[%s3260_s4 + $0x5] ss:$0 sm:$0xff] }
 0x47d   :  { %2383 = vmatprep.subr.mxu1 %v69_v40 }
 0x47e   :  { %v1561_v0 = vsel %vm921_vm7, %v1521_v11, %v1560_v4  ;;  %2384 = vmatpush3.msra.mxu1 %v69_v40 }
 0x47f   :  { %v1562_v16 = vsel %vm923_vm8, %v1528_v49, %v1561_v0  ;;  %2385 = vmatprep.subr.mxu1 %v68_v18 }
 0x480   :  { %2366 = vmatmul.mubr.msk.f32.vlgmr.msra.gmra.mxu0 %vm568_vm1, %v1562_v16  ;;  %2386 = vmatpush3.msra.mxu1 %v68_v18 }
 0x481   :  { %2369 = vmatpush3.msra.mxu0 %v63_v41  ;;  %2387 = vmatprep.subr.mxu1 %v67_v55 }
 0x482   :  { %2370 = vmatprep.subr.mxu0 %v62_v56  ;;  %2388 = vmatpush3.msra.mxu1 %v67_v55 }
 0x483   :  { %2371 = vmatpush3.msra.mxu0 %v62_v56  ;;  %2389 = vmatprep.subr.mxu1 %v66_v52 }
 0x484   :  { %2372 = vmatprep.subr.mxu0 %v61_v10  ;;  %2390 = vmatpush3.msra.mxu1 %v66_v52 }
 0x485   :  { %2373 = vmatpush3.msra.mxu0 %v61_v10  ;;  %2391 = vmatprep.subr.mxu1 %v65_v47 }
 0x486   :  { %2374 = vmatprep.subr.mxu0 %v60_v60  ;;  %2392 = vmatpush3.msra.mxu1 %v65_v47 }
 0x487   :  { %2375 = vmatpush3.msra.mxu0 %v60_v60  ;;  %2393 = vmatprep.subr.mxu1 %v64_v31 }
 0x488   :  { %2394 = vmatpush3.msra.mxu1 %v64_v31  ;;  %v2487_v31 = vmov 0.0  }
 0x489   :  { %2398 = vmatprep.subr.mxu0 %v2487_v31 }
 0x540   :  { %v2367_v17 = vpop.f32.mrf.mxu0 }
 0x541   :  { %v1639_v42 = vadd.f32 %v2367_v17, %v2226_v23 }
 0x542   :  { %v1633_v28 = vpop.f32.mrf.mxu0 }
 0x543   :  { %v1634_v50 = vadd.f32 %v2226_v23, %v1633_v28  ;;  %v1643_v8 = vadd.f32 %v2483_v26, %v1639_v42 }
 0x545   :  { %v1647_v7 = vsel %vm93_vm0, %v1643_v8, 0.0  ;;  %v1642_v33 = vadd.f32 %v2484_v27, %v1634_v50  ;;  %v2234_v27 = vld [vmem:[%s3260_s4 + $0x6] ss:$0 sm:$0xff] }
 0x546   :  { %1648 = vadd.xlane.f32.xlu0 %v1647_v7 }
 0x547   :  { %v1644_v15 = vsel %vm93_vm0, %v1642_v33, 0.0 }
 0x548   :  { %1645 = vadd.xlane.f32.xlu1 %v1644_v15 }
 0x5cf   :  { %v1649_v44 = vpop.xlane.xlu0 %1648 }
 0x5d0   :  { %v1652_v63 = vmul.f32 0.03125, %v1649_v44 }
 0x5d1   :  { %v1646_v38 = vpop.xlane.xlu1 %1645 }
 0x5d2   :  { %v1651_v43 = vmul.f32 0.03125, %v1646_v38  ;;  %v1654_v48 = vsub.f32 %v1643_v8, %v1652_v63 }
 0x5d4   :  { %v1653_v34 = vsub.f32 %v1642_v33, %v1651_v43  ;;  %v1656_v62 = vmul.f32 %v1654_v48, %v1654_v48 }
 0x5d6   :  { %v1655_v61 = vmul.f32 %v1653_v34, %v1653_v34  ;;  %v1660_v46 = vsel %vm93_vm0, %v1656_v62, 0.0 }
 0x5d8   :  { %v1657_v39 = vsel %vm93_vm0, %v1655_v61, 0.0 }
 0x5d9   :  { %1658 = vadd.xlane.f32.xlu0 %v1657_v39 }
 0x5dd   :  { %1661 = vadd.xlane.f32.xlu0 %v1660_v46 }
 0x662   :  { %v1659_v57 = vpop.xlane.xlu0 %1658 }
 0x663   :  { %v1663_v35 = vmul.f32 0.03125, %v1659_v57 }
 0x665   :  { %v1665_v54 = vadd.f32 1e-05, %v1663_v35 }
 0x666   :  { %v1662_v19 = vpop.xlane.xlu0 %1661 }
 0x667   :  { %2461 = vrsqrt.f32 %v1665_v54  ;;  %v1664_v24 = vmul.f32 0.03125, %v1662_v19 }
 0x669   :  { %v1666_v12 = vadd.f32 1e-05, %v1664_v24 }
 0x66b   :  { %2463 = vrsqrt.f32 %v1666_v12 }
 0x674   :  { %v2462_v59 = vpop.eup %2461 }
 0x675   :  { %v1669_v29 = vmul.f32 %v2462_v59, %v1653_v34 }
 0x677   :  { %v1675_v30 = vmul.f32 %v2229_v20, %v1669_v29 }
 0x678   :  { %v2464_v21 = vpop.eup %2463 }
 0x679   :  { %v1670_v51 = vmul.f32 %v2464_v21, %v1654_v48  ;;  %v3157_v13 = vadd.f32 %v2230_v37, %v1675_v30 }
 0x67b   :  { %v1676_v2 = vmul.f32 %v2229_v20, %v1670_v51  ;;  %2376 = vmatprep.mubr.msk.f32.mxu0 %vm93_vm0, %v3157_v13  ;;  %v2238_v51 = vld [vmem:[%s3260_s4 + $0x8] ss:$0 sm:$0xff] }
 0x67d   :  { %v1682_v22 = vadd.f32 %v2230_v37, %v1676_v2  ;;  %v2237_v37 = vld [vmem:[%s3260_s4 + $0x7] ss:$0 sm:$0xff] }
 0x67f   :  { %2377 = vmatmul.mubr.msk.f32.vlgmr.msra.gmra.mxu0 %vm93_vm0, %v1682_v22 }
 0x680   :  { %2402 = vmatprep.mubr.msk.f32.mxu0 %vm2488_vm10, %v2487_v31 }
 0x73f   :  { %v2378_v32 = vpop.f32.mrf.mxu0 }
 0x740   :  { %v1765_v58 = vadd.f32 %v2378_v32, %v2231_v3  ;;  %v86_v32 = vld [vmem:[%s3260_s4 + $0x18] sm:$0xff] }
 0x741   :  { %v1759_v25 = vpop.f32.mrf.mxu0 }
 0x742   :  { %v1769_v36 = vmul.f32 %v1765_v58, %v1765_v58  ;;  %v1760_v53 = vadd.f32 %v2231_v3, %v1759_v25  ;;  %v83_v3 = vld [vmem:[%s3260_s4 + $0xb] sm:$0x1]  ;;  %v85_v25 = vld [vmem:[%s3260_s4 + $0x10] sm:$0xff] }
 0x743   :  { %2417 = vpush %v83_v3 }
 0x744   :  { %v1771_v5 = vmul.f32 %v1769_v36, %v1765_v58  ;;  %v1768_v45 = vmul.f32 %v1760_v53, %v1760_v53 }
 0x746   :  { %v1773_v11 = vmul.f32 0.044715, %v1771_v5  ;;  %v1770_v1 = vmul.f32 %v1768_v45, %v1760_v53  ;;  %v87_v45 = vld [vmem:[%s3260_s4 + $0x20] sm:$0x3] }
 0x748   :  { %v1775_v49 = vadd.f32 %v1773_v11, %v1765_v58  ;;  %v1772_v6 = vmul.f32 0.044715, %v1770_v1 }
 0x74a   :  { %v1777_v4 = vmul.f32 0.7978846, %v1775_v49  ;;  %v1774_v0 = vadd.f32 %v1772_v6, %v1760_v53 }
 0x74c   :  { %2465 = vtanh.f32 %v1777_v4  ;;  %v1776_v16 = vmul.f32 0.7978846, %v1774_v0  ;;  %v2005_v4 = vld [vmem:[%s3261_s5] sm:$0x3] }
 0x74e   :  { %2467 = vtanh.f32 %v1776_v16 }
 0x759   :  { %v2466_v23 = vpop.eup %2465 }
 0x75a   :  { %v1781_v17 = vadd.f32 1.0, %v2466_v23 }
 0x75b   :  { %v2468_v42 = vpop.eup %2467 }
 0x75c   :  { %v1780_v28 = vadd.f32 1.0, %v2468_v42  ;;  %v1783_v50 = vmul.f32 0.5, %v1781_v17 }
 0x75e   :  { %v1782_v26 = vmul.f32 0.5, %v1780_v28  ;;  %v1785_v7 = vmul.f32 %v1783_v50, %v1765_v58 }
 0x760   :  { %v1784_v8 = vmul.f32 %v1782_v26, %v1760_v53 }
 0x762   :  { %2395 = vmatprep.mubr.msk.f32.mxu1 %vm568_vm1, %v1784_v8 }
 0x763   :  { %2396 = vmatmul.mubr.msk.f32.vlgmr.msra.gmra.mxu1 %vm568_vm1, %v1785_v7 }
 0x774   :  { %s2418_s27 = spop %2417 }
 0x775   :  { %v2002_v1 = vstv %s2418_s27 }
 0x823   :  { %v2397_v33 = vpop.f32.mrf.mxu1 }
 0x824   :  { %v1868_v15 = vadd.f32 %v2397_v33, %v2234_v27 }
 0x825   :  { %v1862_v44 = vpop.f32.mrf.mxu1 }
 0x826   :  { %v1863_v63 = vadd.f32 %v2234_v27, %v1862_v44  ;;  %v1872_v38 = vadd.f32 %v1868_v15, %v1682_v22  ;;  %v2239_v22 = vld [vmem:[%s3260_s4 + $0x9] ss:$0 sm:$0xff]  ;;  %v2019_v27 = vld [vmem:[%s3262_s6] sm:$0x3] }
 0x828   :  { %v1876_v43 = vsel %vm93_vm0, %v1872_v38, 0.0  ;;  %v1871_v48 = vadd.f32 %v1863_v63, %v3157_v13  ;;  %v88_v63 = vld [vmem:[%s3260_s4 + $0x28] sm:$0xf] }
 0x829   :  { %1877 = vadd.xlane.f32.xlu1 %v1876_v43 }
 0x82a   :  { %v1873_v34 = vsel %vm93_vm0, %v1871_v48, 0.0 }
 0x82b   :  { %1874 = vadd.xlane.f32.xlu0 %v1873_v34 }
 0x8b2   :  { %v1878_v61 = vpop.xlane.xlu1 %1877 }
 0x8b3   :  { %v1880_v39 = vmul.f32 0.03125, %v1878_v61 }
 0x8b4   :  { %v1875_v62 = vpop.xlane.xlu0 %1874 }
 0x8b5   :  { %v1882_v46 = vsub.f32 %v1872_v38, %v1880_v39  ;;  %v1879_v41 = vmul.f32 0.03125, %v1875_v62 }
 0x8b7   :  { %v1881_v56 = vsub.f32 %v1871_v48, %v1879_v41  ;;  %v1884_v10 = vmul.f32 %v1882_v46, %v1882_v46  ;;  %v2244_v41 = vld [vmem:[%s3260_s4 + $0xa] ss:$0 sm:$0xff] }
 0x8b9   :  { %v1888_v60 = vsel %vm93_vm0, %v1884_v10, 0.0  ;;  %v1883_v57 = vmul.f32 %v1881_v56, %v1881_v56 }
 0x8ba   :  { %1889 = vadd.xlane.f32.xlu1 %v1888_v60 }
 0x8bb   :  { %v1885_v35 = vsel %vm93_vm0, %v1883_v57, 0.0 }
 0x8bc   :  { %1886 = vadd.xlane.f32.xlu0 %v1885_v35  ;;  %v2245_v35 = vld [vmem:[%s3260_s4 + $0xc] ss:$0 sm:$0xff] }
 0x943   :  { %v1890_v54 = vpop.xlane.xlu1 %1889 }
 0x944   :  { %v1892_v19 = vmul.f32 0.03125, %v1890_v54 }
 0x945   :  { %v1887_v24 = vpop.xlane.xlu0 %1886 }
 0x946   :  { %v1894_v12 = vadd.f32 1e-05, %v1892_v19  ;;  %v1891_v59 = vmul.f32 0.03125, %v1887_v24 }
 0x948   :  { %2469 = vrsqrt.f32 %v1894_v12  ;;  %v1893_v20 = vadd.f32 1e-05, %v1891_v59 }
 0x94a   :  { %2471 = vrsqrt.f32 %v1893_v20 }
 0x955   :  { %v2470_v29 = vpop.eup %2469 }
 0x956   :  { %v1898_v30 = vmul.f32 %v2470_v29, %v1882_v46 }
 0x957   :  { %v2472_v21 = vpop.eup %2471 }
 0x958   :  { %v1904_v13 = vmul.f32 %v2237_v37, %v1898_v30  ;;  %v1897_v2 = vmul.f32 %v2472_v21, %v1881_v56 }
 0x95a   :  { %v3208_v14 = vadd.f32 %v2238_v51, %v1904_v13  ;;  %v1903_v9 = vmul.f32 %v2237_v37, %v1897_v2 }
 0x95c   :  { %v1916_v40 = vmul.f32 %v2239_v22, %v3208_v14  ;;  %v3211_v18 = vadd.f32 %v2238_v51, %v1903_v9 }
 0x95e   :  { %v1920_v55 = vsel %vm93_vm0, %v1916_v40, 0.0  ;;  %v1915_v52 = vmul.f32 %v2239_v22, %v3211_v18 }
 0x95f   :  { %1921 = vadd.xlane.f32.xlu1 %v1920_v55 }
 0x960   :  { %v1917_v47 = vsel %vm93_vm0, %v1915_v52, 0.0  ;;  %vm2200_vm0 = vcmask 1024  }
 0x961   :  { %1918 = vadd.xlane.f32.xlu0 %v1917_v47 }
 0x9e8   :  { %v1922_v58 = vpop.xlane.xlu1 %1921 }
 0x9e9   :  { %v1924_v36 = vmul.f32 %v1922_v58, %v86_v32 }
 0x9ea   :  { %v1919_v53 = vpop.xlane.xlu0 %1918 }
 0x9eb   :  { %v1923_v5 = vmul.f32 %v1919_v53, %v85_v25  ;;  %2399 = vmatpush3.msra.mxu0 %v1924_v36 }
 0x9ec   :  { %2400 = vmatprep.subr.mxu0 %v2487_v31 }
 0x9ed   :  { %2401 = vmatpush3.msra.mxu0 %v1923_v5 }
 0x9ee   :  { %2403 = vmatmul.mubr.msk.f32.vlgmr.msra.gmra.mxu0 %vm1925_vm11, %v87_v45  ;;  %2405 = vmatprep.subr.mxu0 %v2487_v31 }
 0x9ef   :  { %2407 = vmatprep.mubr.msk.f32.mxu0 %vm2488_vm10, %v2487_v31  ;;  %2406 = vmatpush3.msk.msra.mxu0 %vm2031_vm13, %v88_v63 }
 0x9f0   :  { %2410 = vmatprep.subr.mxu0 %v2487_v31 }
 0xaae   :  { %v1995_v11 = vpop.f32.mrf.mxu0 }
 0xaaf   :  { %v1999_v49 = vmul.f32 0.5, %v1995_v11 }
 0xab0   :  { %v2404_v6 = vpop.f32.mrf.mxu0 }
 0xab1   :  { %v2004_v0 = vadd.f32 %v2002_v1, %v1999_v49 }
 0xab3   :  { %v2006_v16 = vadd.f32 %v2005_v4, %v2004_v0 }
 0xab5   :  { %v2008_v23 = vsel %vm2007_vm12, %v2006_v16, -inf }
 0xab6   :  { %2009 = vmax.xlane.f32.xlu1 %v2008_v23 }
 0xb3f   :  { %v2010_v17 = vpop.xlane.xlu1 %2009 }
 0xb40   :  { %v2011_v42 = vsub.f32 %v2006_v16, %v2010_v17 }
 0xb42   :  { %v2012_v28 = vmul.f32 1.442695, %v2011_v42 }
 0xb44   :  { %2473 = vpow2.f32 %v2012_v28 }
 0xb51   :  { %v2474_v50 = vpop.eup %2473 }
 0xb52   :  { %v2014_v26 = vsel %vm2007_vm12, %v2474_v50, 0.0 }
 0xb53   :  { %2015 = vadd.xlane.f32.xlu0 %v2014_v26 }
 0xbdc   :  { %v2016_v8 = vpop.xlane.xlu0 %2015 }
 0xbdd   :  { %2475 = vrcp.f32 %v2016_v8 }
 0xbea   :  { %v2476_v7 = vpop.eup %2475 }
 0xbeb   :  { %v2018_v33 = vmul.f32 %v2476_v7, %v2474_v50 }
 0xbed   :  { %v2020_v15 = vmul.f32 %v2019_v27, %v2018_v33 }
 0xbef   :  { %v2021_v44 = vsel %vm2007_vm12, %v2020_v15, 0.0 }
 0xbf0   :  { %2022 = vadd.xlane.f32.xlu1 %v2021_v44 }
 0xc79   :  { %v2023_v38 = vpop.xlane.xlu1 %2022 }
 0xc7a   :  { %v2024_v43 = vmax.f32 %v2023_v38, 1e-09 }
 0xc7c   :  { %2477 = vrcp.f32 %v2024_v43 }
 0xc89   :  { %v2478_v48 = vpop.eup %2477 }
 0xc8a   :  { %v2026_v34 = vmul.f32 %v2478_v48, %v2020_v15 }
 0xc8c   :  { %2408 = vmatmul.mubr.msk.f32.vlgmr.msra.gmra.mxu0 %vm2027_vm14, %v2026_v34 }
 0xc8d   :  { %2411 = vmatpush3.msra.mxu0 %v3208_v14  ;;  %2414 = vmatprep.mubr.msk.f32.mxu0 %vm2488_vm10, %v2487_v31 }
 0xc8e   :  { %2412 = vmatprep.subr.mxu0 %v2487_v31 }
 0xc8f   :  { %2413 = vmatpush3.msra.mxu0 %v3211_v18 }
 0xd4c   :  { %v2101_v61 = vpop.f32.mrf.mxu0 }
 0xd4d   :  { %v2105_v39 = vmul.f32 %v2101_v61, %v87_v45 }
 0xd4e   :  { %v2409_v62 = vpop.f32.mrf.mxu0 }
 0xd4f   :  { %v2106_v46 = vmul.f32 0.5, %v2105_v39 }
 0xd51   :  { %2415 = vmatmul.mubr.msk.f32.vlgmr.msra.gmra.mxu0 %vm1925_vm11, %v2106_v46 }
 0xe11   :  { %v2176_v56 = vpop.f32.mrf.mxu0 }
 0xe12   :  { %v2184_v10 = vmul.f32 %v2244_v41, %v2176_v56 }
 0xe13   :  { %v2416_v60 = vpop.f32.mrf.mxu0 }
 0xe14   :  { %v2186_v57 = vsel %vm2185_vm15, %v2184_v10, 0.0 }
 0xe15   :  { %2187 = vadd.xlane.f32.xlu0 %v2186_v57 }
 0xe9e   :  { %v2188_v54 = vpop.xlane.xlu0 %2187 }
 0xe9f   :  { %v2193_v19 = vadd.f32 %v2245_v35, %v2188_v54 }
 0xea1   :  { %v2194_v24 = vsub.f32 0.0, %v2193_v19 }
 0xea3   :  { %v2195_v12 = vmul.f32 1.442695, %v2194_v24 }
 0xea5   :  { %2479 = vpow2.f32 %v2195_v12 }
 0xeb2   :  { %v2480_v59 = vpop.eup %2479 }
 0xeb3   :  { %v2197_v20 = vadd.f32 1.0, %v2480_v59 }
 0xeb5   :  { %2481 = vrcp.f32 %v2197_v20 }
 0xec2   :  { %v2482_v29 = vpop.eup %2481 }
 0xec3   :  { %2201 = vst.msk [vmem:[%s3263_s7] sm:$0x3] %vm2200_vm0, %v2482_v29 }

</bundles_post_ra>
